<compile_context>
chip_gen: v6e
topology: v6e:2x2x1
jax: 0.10.0
libtpu: 0.0.40
codegen_flags: <defaults>
</compile_context>

<pallas_src>
import functools
import math
from collections import namedtuple

import jax
import jax.numpy as jnp
from jax.experimental import pallas as pl
from jax.experimental.pallas import tpu as pltpu

Output = namedtuple("Output", ["punct_logits", "capit_logits", "loss"])

# Generation-aware: v5e/v6e have 128 MiB physical VMEM, v7x only 64 MiB, so we
# cap the scoped limit at 48 MiB (worst-case tm=512 footprint is ~18 MiB).
VMEM_LIMIT_BYTES = 48 * 1024 * 1024
ROW_TILE_TARGET = 512               # rows per tile (multiple of 8)
COL_TILE_TARGET = 1024              # N tile for very wide linears (mult of 128)
WEIGHT_RESIDENT_BYTES = 8 * 1024 * 1024  # keep full weight resident below this


def _cparams(sem):
    return pltpu.CompilerParams(dimension_semantics=sem,
                                vmem_limit_bytes=VMEM_LIMIT_BYTES)


def _round_up(x, m):
    return (x + m - 1) // m * m


def _row_tile(m, target=ROW_TILE_TARGET):
    if m <= target:
        return m
    if m % target == 0:
        return target
    # Fallback (model_forward pads rows so the forward pass never hits this).
    t = target - (target % 8)
    while t > 8 and m % t != 0:
        t -= 8
    return t if (t > 0 and m % t == 0) else m


def _col_tile(n, k_rows, target=COL_TILE_TARGET):
    # Keep the whole (K, N) bf16 weight resident when it comfortably fits VMEM
    # so activation row tiles are only streamed once (review item 1).
    if n % 128 != 0 or k_rows * n * 2 <= WEIGHT_RESIDENT_BYTES or n <= target:
        return n
    t = min(target, n)
    t -= t % 128
    while t > 128 and n % t != 0:
        t -= 128
    return t if (t > 0 and n % t == 0) else n


# ----------------------------------------------------------------------------
# Pallas kernels
# ----------------------------------------------------------------------------
def _linear_kernel(x_ref, w_ref, b_ref, o_ref, *, activation):
    # bf16 MXU matmul, fp32 accumulation and epilogue.
    y = jnp.dot(x_ref[...].astype(jnp.bfloat16), w_ref[...],
                preferred_element_type=jnp.float32)
    y = y + b_ref[...]
    if activation == "relu":
        y = jnp.maximum(y, 0.0)
    elif activation == "gelu":
        # TODO(synk): tanh-approx GELU; HF BERT uses erf-GELU (~1e-3 delta).
        y = 0.5 * y * (1.0 + jnp.tanh(0.7978845608028654 *
                                      (y + 0.044715 * y * y * y)))
    o_ref[...] = y.astype(o_ref.dtype)


def linear(x, w, b, activation=None, out_dtype=jnp.bfloat16):
    """y = act(x @ w + b); rows tiled, full weight resident when it fits."""
    M, K = x.shape
    N = w.shape[1]
    tm = _row_tile(M)
    tn = _col_tile(N, K)
    grid = (N // tn, M // tm)  # N outer so a weight block stays resident
    return pl.pallas_call(
        functools.partial(_linear_kernel, activation=activation),
        out_shape=jax.ShapeDtypeStruct((M, N), out_dtype),
        grid=grid,
        in_specs=[
            pl.BlockSpec((tm, K), lambda j, i: (i, 0)),
            pl.BlockSpec((K, tn), lambda j, i: (0, j)),
            pl.BlockSpec((1, tn), lambda j, i: (0, j)),
        ],
        out_specs=pl.BlockSpec((tm, tn), lambda j, i: (i, j)),
        compiler_params=_cparams(("parallel", "parallel")),
    )(x, w, b.reshape(1, N))


def _linear_res_ln_kernel(x_ref, w_ref, b_ref, res_ref, g_ref, beta_ref, o_ref,
                          *, eps):
    # fused: y = x @ w + b ; h = residual + y ; LayerNorm(h)  (fp32 math)
    y = jnp.dot(x_ref[...].astype(jnp.bfloat16), w_ref[...],
                preferred_element_type=jnp.float32)
    h = res_ref[...].astype(jnp.float32) + y + b_ref[...]
    mu = jnp.mean(h, axis=-1, keepdims=True)
    var = jnp.mean(jnp.square(h - mu), axis=-1, keepdims=True)
    o_ref[...] = ((h - mu) * jax.lax.rsqrt(var + eps) * g_ref[...]
                  + beta_ref[...]).astype(o_ref.dtype)


def linear_res_ln(x, w, b, residual, gamma, beta, eps=1e-12,
                  out_dtype=jnp.bfloat16):
    """LayerNorm(residual + x @ w + b); full feature dim per tile (LN needs it)."""
    M, K = x.shape
    N = w.shape[1]
    tm = _row_tile(M)
    # TODO(synk): on v7x, mark the constant-index weight/bias/gamma/beta blocks
    # pipeline_mode=pl.Buffered(1) to avoid double-buffering them in 64 MiB VMEM.
    return pl.pallas_call(
        functools.partial(_linear_res_ln_kernel, eps=eps),
        out_shape=jax.ShapeDtypeStruct((M, N), out_dtype),
        grid=(M // tm,),
        in_specs=[
            pl.BlockSpec((tm, K), lambda i: (i, 0)),
            pl.BlockSpec((K, N), lambda i: (0, 0)),
            pl.BlockSpec((1, N), lambda i: (0, 0)),
            pl.BlockSpec((tm, N), lambda i: (i, 0)),
            pl.BlockSpec((1, N), lambda i: (0, 0)),
            pl.BlockSpec((1, N), lambda i: (0, 0)),
        ],
        out_specs=pl.BlockSpec((tm, N), lambda i: (i, 0)),
        compiler_params=_cparams(("parallel",)),
    )(x, w, b.reshape(1, N), residual, gamma.reshape(1, N), beta.reshape(1, N))


def _ln_kernel(x_ref, g_ref, b_ref, o_ref, *, eps):
    x = x_ref[...].astype(jnp.float32)
    mu = jnp.mean(x, axis=-1, keepdims=True)
    var = jnp.mean(jnp.square(x - mu), axis=-1, keepdims=True)
    o_ref[...] = ((x - mu) * jax.lax.rsqrt(var + eps) * g_ref[...]
                  + b_ref[...]).astype(o_ref.dtype)


def layer_norm(x, g, b, eps=1e-12, out_dtype=jnp.bfloat16):
    M, H = x.shape
    tm = _row_tile(M)
    return pl.pallas_call(
        functools.partial(_ln_kernel, eps=eps),
        out_shape=jax.ShapeDtypeStruct((M, H), out_dtype),
        grid=(M // tm,),
        in_specs=[
            pl.BlockSpec((tm, H), lambda i: (i, 0)),
            pl.BlockSpec((1, H), lambda i: (0, 0)),
            pl.BlockSpec((1, H), lambda i: (0, 0)),
        ],
        out_specs=pl.BlockSpec((tm, H), lambda i: (i, 0)),
        compiler_params=_cparams(("parallel",)),
    )(x, g.reshape(1, H), b.reshape(1, H))


def _attn_kernel(qkv_ref, m_ref, o_ref, *, n_heads, d_head):
    # One grid step handles ALL heads of one batch element. Each head's context
    # is stored straight into its output slice: no concatenate, at most one
    # live head output (kills the vreg spills flagged in review).
    qkv = qkv_ref[0]            # (T, 3H) bf16
    m = m_ref[0]                # (1, T) fp32 additive key mask
    H = n_heads * d_head
    for h in range(n_heads):
        lo = h * d_head
        q = qkv[:, lo:lo + d_head]
        k = qkv[:, H + lo:H + lo + d_head]
        v = qkv[:, 2 * H + lo:2 * H + lo + d_head]
        # 1/sqrt(d_head) is folded into the Q columns of w_qkv at init.
        s = jax.lax.dot_general(q, k, (((1,), (1,)), ((), ())),
                                preferred_element_type=jnp.float32)
        s = s + m
        s = s - jnp.max(s, axis=-1, keepdims=True)
        p = jnp.exp(s)
        p = p * pl.reciprocal(jnp.sum(p, axis=-1, keepdims=True), approx=True)
        o = jnp.dot(p.astype(jnp.bfloat16), v, preferred_element_type=jnp.float32)
        o_ref[0, :, lo:lo + d_head] = o.astype(o_ref.dtype)
    # TODO(synk): a head-major relayout + batched dot_general would also drop
    # the per-head 64-lane-offset slices (v6e XLU pressure); kept the loop form
    # here for guaranteed Mosaic lowering.


def attention(qkv_bth, add_mask, n_heads, d_head):
    """qkv_bth: (B, T, 3H) bf16; add_mask: (B, 1, T) fp32 -> (B, T, H) bf16."""
    B, T, threeH = qkv_bth.shape
    H = n_heads * d_head
    return pl.pallas_call(
        functools.partial(_attn_kernel, n_heads=n_heads, d_head=d_head),
        out_shape=jax.ShapeDtypeStruct((B, T, H), jnp.bfloat16),
        grid=(B,),
        in_specs=[
            pl.BlockSpec((1, T, threeH), lambda b: (b, 0, 0)),
            pl.BlockSpec((1, 1, T), lambda b: (b, 0, 0)),
        ],
        out_specs=pl.BlockSpec((1, T, H), lambda b: (b, 0, 0)),
        compiler_params=_cparams(("parallel",)),
    )(qkv_bth, add_mask)


def _clf_ce_kernel(x_ref, w_ref, b_ref, lab_ref, logits_ref, nll_ref,
                   *, num_classes):
    # Classifier matmul fused with per-row cross-entropy. Output classes are
    # padded to 128 lanes (lane-dense vst); pad columns are masked out of the
    # logsumexp with a static column predicate.
    logits = jnp.dot(x_ref[...].astype(jnp.bfloat16), w_ref[...],
                     preferred_element_type=jnp.float32) + b_ref[...]
    logits_ref[...] = logits                                  # (tm, 128) fp32
    cols = jax.lax.broadcasted_iota(jnp.int32, logits.shape, 1)
    mlog = jnp.where(cols < num_classes, logits, jnp.float32(-1e30))
    mx = jnp.max(mlog, axis=-1, keepdims=True)
    lse = mx + jnp.log(jnp.sum(jnp.exp(mlog - mx), axis=-1, keepdims=True))
    labels = lab_ref[...]                                     # (tm, 1) int32
    picked = jnp.sum(jnp.where(cols == labels, logits, 0.0),
                     axis=-1, keepdims=True)
    nll_ref[...] = lse - picked                               # (tm, 1) fp32


def classifier_ce(x, w, b, labels, loss_mask):
    """Returns (logits (M, C) fp32, masked-mean CE loss scalar)."""
    M, D = x.shape
    C = w.shape[1]
    CP = _round_up(max(C, 128), 128)               # lane-dense logits store
    if CP != C:
        w = jnp.concatenate([w, jnp.zeros((D, CP - C), w.dtype)], axis=1)
        b = jnp.concatenate([b, jnp.zeros((CP - C,), b.dtype)])
    tm = _row_tile(M)
    logits, nll = pl.pallas_call(
        functools.partial(_clf_ce_kernel, num_classes=C),
        out_shape=(
            jax.ShapeDtypeStruct((M, CP), jnp.float32),
            jax.ShapeDtypeStruct((M, 1), jnp.float32),
        ),
        grid=(M // tm,),
        in_specs=[
            pl.BlockSpec((tm, D), lambda i: (i, 0)),
            pl.BlockSpec((D, CP), lambda i: (0, 0)),
            pl.BlockSpec((1, CP), lambda i: (0, 0)),
            pl.BlockSpec((tm, 1), lambda i: (i, 0)),
        ],
        out_specs=(
            pl.BlockSpec((tm, CP), lambda i: (i, 0)),
            pl.BlockSpec((tm, 1), lambda i: (i, 0)),
        ),
        compiler_params=_cparams(("parallel",)),   # no resident accumulators
    )(x, w, b.reshape(1, CP), labels.reshape(M, 1).astype(jnp.int32))
    # masked-mean reduction (ignore_index=-100 AND loss_mask) done in JAX —
    # tiny (M,) vectors, keeps the Pallas grid fully parallel across cores.
    valid = loss_mask.astype(jnp.float32) * (labels != -100).astype(jnp.float32)
    lsum = jnp.sum(nll[:, 0] * valid)
    csum = jnp.sum(valid)
    loss = jnp.where(csum > 0, lsum / jnp.maximum(csum, 1.0), 0.0)
    return logits[:, :C], loss


# ----------------------------------------------------------------------------
# Model components (glue around the Pallas kernels)
# ----------------------------------------------------------------------------
def encoder_layer(h2d, p, add_mask, B, T, pad, cfg):
    H = cfg["hidden"]
    nH = cfg["heads"]
    dh = H // nH
    M = B * T
    # fused QKV projection (H -> 3H), bf16 residual stream throughout
    # TODO(synk): QKV projection could be fused into the per-batch attention
    # kernel to skip the (B,T,3H) HBM round trip (biggest win on v5e).
    qkv = linear(h2d, p["w_qkv"], p["b_qkv"], out_dtype=jnp.bfloat16)
    qkv_b = (qkv[:M] if pad else qkv).reshape(B, T, 3 * H)
    ctx = attention(qkv_b, add_mask, nH, dh)                   # (B, T, H) bf16
    ctx2d = ctx.reshape(M, H)
    if pad:
        ctx2d = jnp.pad(ctx2d, ((0, pad), (0, 0)))
    # attention output projection + residual + LayerNorm (fused epilogue)
    h1 = linear_res_ln(ctx2d, p["wo"], p["bo"], h2d, p["ln1_g"], p["ln1_b"])
    # FFN
    ff = linear(h1, p["w_inter"], p["b_inter"], activation="gelu",
                out_dtype=jnp.bfloat16)
    return linear_res_ln(ff, p["w_out"], p["b_out"], h1, p["ln2_g"], p["ln2_b"])


def token_classifier_with_loss(h2d, clf, labels, loss_mask):
    x = h2d
    for w, b in clf["hidden"]:
        # dropout(p=0.1) is identity at inference time
        x = linear(x, w, b, activation="relu", out_dtype=jnp.bfloat16)
    return classifier_ce(x, clf["w_out"], clf["b_out"], labels, loss_mask)


def model_forward(params, cfg, input_ids, subtokens_mask, punct_labels,
                  capit_labels, segment_ids, input_mask, loss_mask):
    del subtokens_mask  # not used by the reference forward()
    B, T = input_ids.shape
    H = cfg["hidden"]
    M = B * T
    # Pad the flattened token axis so row tiles divide evenly (review item 11);
    # pad rows are excluded from the loss and sliced off the logits.
    M_pad = _round_up(M, 8) if M <= ROW_TILE_TARGET else _round_up(M, ROW_TILE_TARGET)
    pad = M_pad - M

    # BERT embeddings (gathers stay in JAX; LayerNorm is a Pallas kernel)
    emb = (params["word_emb"][input_ids]
           + params["pos_emb"][:T][None, :, :]
           + params["type_emb"][segment_ids])
    x = emb.reshape(M, H)
    if pad:
        x = jnp.pad(x, ((0, pad), (0, 0)))
    h = layer_norm(x, params["emb_ln_g"], params["emb_ln_b"])  # bf16 stream

    add_mask = ((1.0 - input_mask.astype(jnp.float32)) * -1e9).reshape(B, 1, T)
    for lp in params["layers"]:
        h = encoder_layer(h, lp, add_mask, B, T, pad, cfg)
    # h: (M_pad, H) bf16 == last-layer hidden states of the BERT encoder

    punct_labels_f = punct_labels.reshape(-1)
    capit_labels_f = capit_labels.reshape(-1)
    mask_f = loss_mask.reshape(-1).astype(jnp.float32)
    if pad:
        punct_labels_f = jnp.pad(punct_labels_f, (0, pad), constant_values=-100)
        capit_labels_f = jnp.pad(capit_labels_f, (0, pad), constant_values=-100)
        mask_f = jnp.pad(mask_f, (0, pad))

    punct_logits2d, punct_loss = token_classifier_with_loss(
        h, params["punct_clf"], punct_labels_f, mask_f)
    capit_logits2d, capit_loss = token_classifier_with_loss(
        h, params["capit_clf"], capit_labels_f, mask_f)
    loss = punct_loss + capit_loss  # AggregatorLoss(num_losses=2) == sum

    return Output(
        punct_logits=punct_logits2d[:M].reshape(B, T, -1).astype(jnp.float32),
        capit_logits=capit_logits2d[:M].reshape(B, T, -1).astype(jnp.float32),
        loss=loss,
    )


# ----------------------------------------------------------------------------
# Deterministic parameter init (synthetic, BERT-style N(0, 0.02))
# Matmul weights stored in bf16 (MXU-native); biases / LN params fp32.
# The 1/sqrt(d_head) attention scale is folded into the Q columns of w_qkv.
# ----------------------------------------------------------------------------
def init_model(key, cfg):
    keys = iter(jax.random.split(key, 512))
    bf16 = jnp.bfloat16

    def nrm_f32(shape):
        return 0.02 * jax.random.normal(next(keys), shape, dtype=jnp.float32)

    def nrm(shape, dtype=jnp.float32):
        return nrm_f32(shape).astype(dtype)

    H, I = cfg["hidden"], cfg["inter"]
    dh = H // cfg["heads"]
    q_scale = 1.0 / math.sqrt(dh)
    params = {
        "word_emb": nrm((cfg["vocab"], H)),
        "pos_emb": nrm((cfg["max_pos"], H)),
        "type_emb": nrm((cfg["type_vocab"], H)),
        "emb_ln_g": jnp.ones((H,), jnp.float32),
        "emb_ln_b": jnp.zeros((H,), jnp.float32),
        "layers": [],
    }
    for _ in range(cfg["num_layers"]):
        w_qkv = nrm_f32((H, 3 * H))
        w_qkv = w_qkv.at[:, :H].multiply(q_scale)   # fold attention scale
        b_qkv = jnp.zeros((3 * H,), jnp.float32)    # (Q-bias would be scaled too)
        params["layers"].append({
            "w_qkv": w_qkv.astype(bf16), "b_qkv": b_qkv,
            "wo": nrm((H, H), bf16), "bo": jnp.zeros((H,), jnp.float32),
            "ln1_g": jnp.ones((H,), jnp.float32), "ln1_b": jnp.zeros((H,), jnp.float32),
            "w_inter": nrm((H, I), bf16), "b_inter": jnp.zeros((I,), jnp.float32),
            "w_out": nrm((I, H), bf16), "b_out": jnp.zeros((H,), jnp.float32),
            "ln2_g": jnp.ones((H,), jnp.float32), "ln2_b": jnp.zeros((H,), jnp.float32),
        })

    def make_clf(in_dim, hid, num_classes, num_layers):
        hidden = []
        d = in_dim
        for _ in range(num_layers):
            hidden.append((nrm((d, hid), bf16), jnp.zeros((hid,), jnp.float32)))
            d = hid
        return {"hidden": hidden,
                "w_out": nrm((d, num_classes), bf16),
                "b_out": jnp.zeros((num_classes,), jnp.float32)}

    params["punct_clf"] = make_clf(H, cfg["punct_hidden"], cfg["num_punct"],
                                   cfg["punct_num_layers"])
    params["capit_clf"] = make_clf(H, cfg["capit_hidden"], cfg["num_capit"],
                                   cfg["capit_num_layers"])
    return params


# ----------------------------------------------------------------------------
if __name__ == "__main__":
    # Small synthetic config (real model: hidden=768, 12 heads, inter=3072,
    # clf hidden=512, 12 layers). M = B*T = 512 == ROW_TILE_TARGET so the full
    # row-tiling / padding path is exercised without padding overhead.
    cfg = dict(vocab=128, type_vocab=2, max_pos=128, hidden=128, heads=2,
               inter=256, num_layers=2, punct_hidden=128, capit_hidden=128,
               num_punct=4, num_capit=2, punct_num_layers=1, capit_num_layers=11)
    assert cfg["hidden"] % cfg["heads"] == 0

    key = jax.random.PRNGKey(0)
    pkey, dkey = jax.random.split(key)
    params = init_model(pkey, cfg)

    B, T = 4, 128
    k1, k2, k3 = jax.random.split(dkey, 3)
    input_ids = jax.random.randint(k1, (B, T), 0, cfg["vocab"], dtype=jnp.int32)
    segment_ids = jnp.zeros((B, T), jnp.int32)
    input_mask = jnp.ones((B, T), jnp.int32).at[1, T - 16:].set(0)  # pad tail
    subtokens_mask = input_mask
    loss_mask = input_mask
    punct_labels = jax.random.randint(k2, (B, T), 0, cfg["num_punct"], dtype=jnp.int32)
    punct_labels = punct_labels.at[0, 0].set(-100)  # exercise ignore_index
    capit_labels = jax.random.randint(k3, (B, T), 0, cfg["num_capit"], dtype=jnp.int32)

    out = model_forward(params, cfg, input_ids, subtokens_mask, punct_labels,
                        capit_labels, segment_ids, input_mask, loss_mask)
    jax.block_until_ready((out.punct_logits, out.capit_logits, out.loss))

    assert out.punct_logits.shape == (B, T, cfg["num_punct"])
    assert out.capit_logits.shape == (B, T, cfg["num_capit"])
    assert out.loss.shape == ()
    assert bool(jnp.isfinite(out.loss))
    assert bool(jnp.all(jnp.isfinite(out.punct_logits)))
    assert bool(jnp.all(jnp.isfinite(out.capit_logits)))
    # TODO(synk): dropout layers are treated as identity (inference mode).
    print("KERNEL_OK")
</pallas_src>

<mosaic_0001>
module attributes {stable_mosaic.version = 11 : i64} {
  func.func @_ln_kernel(%arg0: i32, %arg1: memref<512x128xf32, #tpu.memory_space<vmem>>, %arg2: memref<1x128xf32, #tpu.memory_space<vmem>>, %arg3: memref<1x128xf32, #tpu.memory_space<vmem>>, %arg4: memref<512x128xbf16, #tpu.memory_space<vmem>>) attributes {dimension_semantics = [#tpu.dimension_semantics<parallel>], iteration_bounds = array<i64: 1>, scalar_prefetch = 0 : i64, scratch_operands = 0 : i64, tpu.core_type = #tpu.core_type<tc>, window_params = [{transform_indices = @transform_0, window_bounds = array<i64: 512, 128>}, {pipeline_mode = #tpu.pipeline_mode<synchronous>, transform_indices = @transform_1, window_bounds = array<i64: 1, 128>}, {pipeline_mode = #tpu.pipeline_mode<synchronous>, transform_indices = @transform_2, window_bounds = array<i64: 1, 128>}, {transform_indices = @transform_3, window_bounds = array<i64: 512, 128>}]} {
    %c0 = arith.constant 0 : index
    %c0_0 = arith.constant 0 : index
    %0 = vector.load %arg1[%c0, %c0_0] : memref<512x128xf32, #tpu.memory_space<vmem>>, vector<512x128xf32>
    %cst = arith.constant dense<0.000000e+00> : vector<512xf32>
    %1 = vector.multi_reduction <add>, %0, %cst [1] : vector<512x128xf32> to vector<512xf32>
    %2 = vector.shape_cast %1 : vector<512xf32> to vector<512x1xf32>
    %cst_1 = arith.constant 1.280000e+02 : f32
    %3 = vector.broadcast %cst_1 : f32 to vector<512x1xf32>
    %4 = arith.divf %2, %3 : vector<512x1xf32>
    %5 = vector.broadcast %4 : vector<512x1xf32> to vector<512x128xf32>
    %6 = arith.subf %0, %5 : vector<512x128xf32>
    %7 = arith.mulf %6, %6 : vector<512x128xf32>
    %cst_2 = arith.constant dense<0.000000e+00> : vector<512xf32>
    %8 = vector.multi_reduction <add>, %7, %cst_2 [1] : vector<512x128xf32> to vector<512xf32>
    %9 = vector.shape_cast %8 : vector<512xf32> to vector<512x1xf32>
    %cst_3 = arith.constant 1.280000e+02 : f32
    %10 = vector.broadcast %cst_3 : f32 to vector<512x1xf32>
    %11 = arith.divf %9, %10 : vector<512x1xf32>
    %12 = vector.broadcast %4 : vector<512x1xf32> to vector<512x128xf32>
    %13 = arith.subf %0, %12 : vector<512x128xf32>
    %cst_4 = arith.constant 9.99999996E-13 : f32
    %14 = vector.broadcast %cst_4 : f32 to vector<512x1xf32>
    %15 = arith.addf %11, %14 : vector<512x1xf32>
    %16 = math.rsqrt %15 : vector<512x1xf32>
    %17 = vector.broadcast %16 : vector<512x1xf32> to vector<512x128xf32>
    %18 = arith.mulf %13, %17 : vector<512x128xf32>
    %c0_5 = arith.constant 0 : index
    %c0_6 = arith.constant 0 : index
    %19 = vector.load %arg2[%c0_5, %c0_6] : memref<1x128xf32, #tpu.memory_space<vmem>>, vector<1x128xf32>
    %20 = vector.broadcast %19 : vector<1x128xf32> to vector<512x128xf32>
    %21 = arith.mulf %18, %20 : vector<512x128xf32>
    %c0_7 = arith.constant 0 : index
    %c0_8 = arith.constant 0 : index
    %22 = vector.load %arg3[%c0_7, %c0_8] : memref<1x128xf32, #tpu.memory_space<vmem>>, vector<1x128xf32>
    %23 = vector.broadcast %22 : vector<1x128xf32> to vector<512x128xf32>
    %24 = arith.addf %21, %23 : vector<512x128xf32>
    %25 = arith.truncf %24 : vector<512x128xf32> to vector<512x128xbf16>
    %c0_9 = arith.constant 0 : index
    %c0_10 = arith.constant 0 : index
    %26 = vector.load %arg4[%c0_9, %c0_10] : memref<512x128xbf16, #tpu.memory_space<vmem>>, vector<512x128xbf16>
    tpu.vector_store %arg4[%c0_9, %c0_10], %25 {strides = array<i32>} : memref<512x128xbf16, #tpu.memory_space<vmem>>, vector<512x128xbf16>,
    return
  }
  func.func @transform_0(%arg0: i32) -> (i32, i32) {
    %c0_i32 = arith.constant 0 : i32
    %c0_i32_0 = arith.constant 0 : i32
    return %arg0, %c0_i32 : i32, i32
  }
  func.func @transform_1(%arg0: i32) -> (i32, i32) {
    %c0_i32 = arith.constant 0 : i32
    %c0_i32_0 = arith.constant 0 : i32
    %c0_i32_1 = arith.constant 0 : i32
    return %c0_i32, %c0_i32_0 : i32, i32
  }
  func.func @transform_2(%arg0: i32) -> (i32, i32) {
    %c0_i32 = arith.constant 0 : i32
    %c0_i32_0 = arith.constant 0 : i32
    %c0_i32_1 = arith.constant 0 : i32
    return %c0_i32, %c0_i32_0 : i32, i32
  }
  func.func @transform_3(%arg0: i32) -> (i32, i32) {
    %c0_i32 = arith.constant 0 : i32
    %c0_i32_0 = arith.constant 0 : i32
    return %arg0, %c0_i32 : i32, i32
  }
}

</mosaic_0001>

<bundles_post_ra>
// kernel: tpu_custom_call.1
= control target key start
LH: loop header
LB: loop body
LE: loop exit
PB: predicated region body
PF: predicated region fallthrough
CT: control target
= control target key end

     0   :  { %8 = vsyncpa [#allocation3], 0  ;;  %s2518_s0 = inlined_call_operand.hbm [shape: f32[512,128], index: 0, kind: input, shape index: {}]   ;;  %s2519_s1 = inlined_call_operand.vmem [shape: f32[1,128], index: 1, kind: input, shape index: {}]   ;;  %s2520_s2 = inlined_call_operand.vmem [shape: f32[1,128], index: 2, kind: input, shape index: {}]   ;;  %s2521_s3 = inlined_call_operand.hbm [shape: bf16[512,128], index: 3, kind: output, shape index: {}]  }
   0x1   :  { %9 = vsyncpa [#allocation4], 0  ;;  %s1778_s12 = smov [#allocation2]  }
   0x2   :  { %s15_s13 = sshll.u32 %s1778_s12, 4  ;;  %s16_s13 = int_to_ptr.vmem [resolvable:$true] %s15_s13 }
   0x3   :  { %s1742_s14 = scalar_lea.vmem %s16_s13, 8192  ;;  %p1747_p1 = scmp.lt.s32.totalorder %s16_s13, %s16_s13 }
   0x4   :  { %p1743_p0 = scmp.ne.s32.totalorder %s16_s13, %s1742_s14  ;;  %p1748_p2 = scmp.lt.s32.totalorder %s1742_s14, %s1742_s14 }
   0x6   :  { %p1749_p3 = por %p1748_p2, %p1747_p1 }
   0x8   :  { %p1750_p4 = pnand %p1749_p3, %p1743_p0 }
   0xa   :  { %1753 = shalt.err (!%p1750_p4)
}
   0xb   :  { %s1779_s15 = smov 128   ;;  %s1780_s16 = smov 8  }
   0xc   :  { %21 = dma.hbm_to_vmem [thread:$0]  %s2518_s0, 8192, %s16_s13, [#allocation3], %s1779_s15, %s1779_s15, %s1780_s16  }
   0xd   :  { %1774 = dma.done.wait [#allocation3], 8192  }
   0xe   :  { %1775 = vsyncadd [#allocation3], 4294959104  ;;  %v1807_v0 = vld [vmem:[#allocation2] sm:$0xff]  ;;  %v1809_v1 = vld [vmem:[#allocation2 + $0x10] sm:$0xff] }
   0xf   :  { %93 = vadd.xlane.f32.xlu0 %v1807_v0  ;;  %97 = vadd.xlane.f32.xlu1 %v1809_v1  ;;  %v1813_v2 = vld [vmem:[#allocation2 + $0x8] sm:$0xff]  ;;  %v1815_v3 = vld [vmem:[#allocation2 + $0x18] sm:$0xff]  ;;  %v1819_v4 = vld [vmem:[#allocation2 + $0x20] sm:$0xff] }
  0x10   :  { %v1821_v5 = vld [vmem:[#allocation2 + $0x28] sm:$0xff]  ;;  %v1825_v6 = vld [vmem:[#allocation2 + $0x30] sm:$0xff]  ;;  %v1827_v7 = vld [vmem:[#allocation2 + $0x38] sm:$0xff] }
  0x11   :  { %v1831_v8 = vld [vmem:[#allocation2 + $0x40] sm:$0xff]  ;;  %v1833_v9 = vld [vmem:[#allocation2 + $0x48] sm:$0xff]  ;;  %v1837_v10 = vld [vmem:[#allocation2 + $0x50] sm:$0xff] }
  0x12   :  { %v1839_v11 = vld [vmem:[#allocation2 + $0x58] sm:$0xff]  ;;  %v1843_v12 = vld [vmem:[#allocation2 + $0x60] sm:$0xff]  ;;  %v1845_v13 = vld [vmem:[#allocation2 + $0x68] sm:$0xff] }
  0x13   :  { %95 = vadd.xlane.f32.xlu0 %v1813_v2  ;;  %99 = vadd.xlane.f32.xlu1 %v1815_v3  ;;  %v1849_v14 = vld [vmem:[#allocation2 + $0x70] sm:$0xff]  ;;  %v1851_v15 = vld [vmem:[#allocation2 + $0x78] sm:$0xff]  ;;  %v1855_v16 = vld [vmem:[#allocation2 + $0x80] sm:$0xff] }
  0x14   :  { %v1857_v17 = vld [vmem:[#allocation2 + $0x88] sm:$0xff]  ;;  %v1861_v18 = vld [vmem:[#allocation2 + $0x90] sm:$0xff]  ;;  %v1863_v19 = vld [vmem:[#allocation2 + $0x98] sm:$0xff] }
  0x15   :  { %v1867_v20 = vld [vmem:[#allocation2 + $0xa0] sm:$0xff]  ;;  %v1869_v21 = vld [vmem:[#allocation2 + $0xa8] sm:$0xff]  ;;  %v1873_v22 = vld [vmem:[#allocation2 + $0xb0] sm:$0xff] }
  0x16   :  { %v1875_v23 = vld [vmem:[#allocation2 + $0xb8] sm:$0xff]  ;;  %v1879_v24 = vld [vmem:[#allocation2 + $0xc0] sm:$0xff]  ;;  %v1881_v25 = vld [vmem:[#allocation2 + $0xc8] sm:$0xff] }
  0x17   :  { %101 = vadd.xlane.f32.xlu0 %v1819_v4  ;;  %103 = vadd.xlane.f32.xlu1 %v1821_v5  ;;  %v1885_v26 = vld [vmem:[#allocation2 + $0xd0] sm:$0xff]  ;;  %v1887_v27 = vld [vmem:[#allocation2 + $0xd8] sm:$0xff]  ;;  %v1891_v28 = vld [vmem:[#allocation2 + $0xe0] sm:$0xff] }
  0x18   :  { %v1893_v29 = vld [vmem:[#allocation2 + $0xe8] sm:$0xff]  ;;  %v1897_v30 = vld [vmem:[#allocation2 + $0xf0] sm:$0xff]  ;;  %v1899_v31 = vld [vmem:[#allocation2 + $0xf8] sm:$0xff] }
  0x19   :  { %v1903_v32 = vld [vmem:[#allocation2 + $0x100] sm:$0xff]  ;;  %v1905_v33 = vld [vmem:[#allocation2 + $0x108] sm:$0xff]  ;;  %v1909_v34 = vld [vmem:[#allocation2 + $0x110] sm:$0xff] }
  0x1a   :  { %v1911_v35 = vld [vmem:[#allocation2 + $0x118] sm:$0xff]  ;;  %v1915_v36 = vld [vmem:[#allocation2 + $0x120] sm:$0xff]  ;;  %v1917_v37 = vld [vmem:[#allocation2 + $0x128] sm:$0xff] }
  0x1b   :  { %105 = vadd.xlane.f32.xlu0 %v1825_v6  ;;  %107 = vadd.xlane.f32.xlu1 %v1827_v7  ;;  %v1921_v38 = vld [vmem:[#allocation2 + $0x130] sm:$0xff]  ;;  %v1923_v39 = vld [vmem:[#allocation2 + $0x138] sm:$0xff]  ;;  %v1927_v40 = vld [vmem:[#allocation2 + $0x140] sm:$0xff] }
  0x1c   :  { %v1929_v41 = vld [vmem:[#allocation2 + $0x148] sm:$0xff]  ;;  %v1933_v42 = vld [vmem:[#allocation2 + $0x150] sm:$0xff]  ;;  %v1935_v43 = vld [vmem:[#allocation2 + $0x158] sm:$0xff] }
  0x1d   :  { %v1939_v44 = vld [vmem:[#allocation2 + $0x160] sm:$0xff]  ;;  %v1941_v45 = vld [vmem:[#allocation2 + $0x168] sm:$0xff]  ;;  %v1945_v46 = vld [vmem:[#allocation2 + $0x170] sm:$0xff] }
  0x1e   :  { %v1947_v47 = vld [vmem:[#allocation2 + $0x178] sm:$0xff]  ;;  %v1951_v48 = vld [vmem:[#allocation2 + $0x180] sm:$0xff]  ;;  %v1953_v49 = vld [vmem:[#allocation2 + $0x188] sm:$0xff] }
  0x1f   :  { %109 = vadd.xlane.f32.xlu0 %v1831_v8  ;;  %111 = vadd.xlane.f32.xlu1 %v1833_v9  ;;  %v1957_v50 = vld [vmem:[#allocation2 + $0x190] sm:$0xff]  ;;  %v1959_v51 = vld [vmem:[#allocation2 + $0x198] sm:$0xff]  ;;  %v1963_v52 = vld [vmem:[#allocation2 + $0x1a0] sm:$0xff] }
  0x20   :  { %2555 = vst [vmem:[#allocation8_spill] sm:$0xff] %v1959_v51  ;;  %2556 = vst [vmem:[#allocation9_spill] sm:$0xff] %v1963_v52  ;;  %v1965_v53 = vld [vmem:[#allocation2 + $0x1a8] sm:$0xff]  ;;  %v1969_v54 = vld [vmem:[#allocation2 + $0x1b0] sm:$0xff] }
  0x21   :  { %2557 = vst [vmem:[#allocation10_spill] sm:$0xff] %v1965_v53  ;;  %2558 = vst [vmem:[#allocation11_spill] sm:$0xff] %v1969_v54  ;;  %v1971_v55 = vld [vmem:[#allocation2 + $0x1b8] sm:$0xff]  ;;  %v1975_v56 = vld [vmem:[#allocation2 + $0x1c0] sm:$0xff] }
  0x22   :  { %2559 = vst [vmem:[#allocation12_spill] sm:$0xff] %v1971_v55  ;;  %2560 = vst [vmem:[#allocation13_spill] sm:$0xff] %v1975_v56  ;;  %v1977_v57 = vld [vmem:[#allocation2 + $0x1c8] sm:$0xff]  ;;  %v1981_v58 = vld [vmem:[#allocation2 + $0x1d0] sm:$0xff] }
  0x23   :  { %113 = vadd.xlane.f32.xlu0 %v1837_v10  ;;  %115 = vadd.xlane.f32.xlu1 %v1839_v11  ;;  %2561 = vst [vmem:[#allocation14_spill] sm:$0xff] %v1977_v57  ;;  %2562 = vst [vmem:[#allocation15_spill] sm:$0xff] %v1981_v58  ;;  %v1983_v59 = vld [vmem:[#allocation2 + $0x1d8] sm:$0xff]  ;;  %v1987_v60 = vld [vmem:[#allocation2 + $0x1e0] sm:$0xff] }
  0x24   :  { %2563 = vst [vmem:[#allocation16_spill] sm:$0xff] %v1983_v59  ;;  %2564 = vst [vmem:[#allocation17_spill] sm:$0xff] %v1987_v60  ;;  %v1989_v61 = vld [vmem:[#allocation2 + $0x1e8] sm:$0xff]  ;;  %v1993_v62 = vld [vmem:[#allocation2 + $0x1f0] sm:$0xff] }
  0x25   :  { %2565 = vst [vmem:[#allocation18_spill] sm:$0xff] %v1989_v61  ;;  %v1995_v63 = vld [vmem:[#allocation2 + $0x1f8] sm:$0xff] }
  0x26   :  { %2566 = vst [vmem:[#allocation19_spill] sm:$0xff] %v1995_v63 }
  0x27   :  { %117 = vadd.xlane.f32.xlu0 %v1843_v12  ;;  %119 = vadd.xlane.f32.xlu1 %v1845_v13 }
  0x2b   :  { %121 = vadd.xlane.f32.xlu0 %v1849_v14  ;;  %123 = vadd.xlane.f32.xlu1 %v1851_v15 }
  0x2f   :  { %125 = vadd.xlane.f32.xlu0 %v1855_v16  ;;  %127 = vadd.xlane.f32.xlu1 %v1857_v17 }
  0x33   :  { %129 = vadd.xlane.f32.xlu0 %v1861_v18  ;;  %131 = vadd.xlane.f32.xlu1 %v1863_v19 }
  0x37   :  { %133 = vadd.xlane.f32.xlu0 %v1867_v20  ;;  %135 = vadd.xlane.f32.xlu1 %v1869_v21 }
  0x3b   :  { %137 = vadd.xlane.f32.xlu0 %v1873_v22  ;;  %139 = vadd.xlane.f32.xlu1 %v1875_v23 }
  0x3f   :  { %141 = vadd.xlane.f32.xlu0 %v1879_v24  ;;  %143 = vadd.xlane.f32.xlu1 %v1881_v25 }
  0x43   :  { %145 = vadd.xlane.f32.xlu0 %v1885_v26  ;;  %147 = vadd.xlane.f32.xlu1 %v1887_v27 }
  0x47   :  { %149 = vadd.xlane.f32.xlu0 %v1891_v28  ;;  %151 = vadd.xlane.f32.xlu1 %v1893_v29 }
  0x4b   :  { %153 = vadd.xlane.f32.xlu0 %v1897_v30  ;;  %155 = vadd.xlane.f32.xlu1 %v1899_v31 }
  0x4f   :  { %157 = vadd.xlane.f32.xlu0 %v1903_v32  ;;  %159 = vadd.xlane.f32.xlu1 %v1905_v33 }
  0x53   :  { %161 = vadd.xlane.f32.xlu0 %v1909_v34  ;;  %163 = vadd.xlane.f32.xlu1 %v1911_v35 }
  0x57   :  { %165 = vadd.xlane.f32.xlu0 %v1915_v36  ;;  %167 = vadd.xlane.f32.xlu1 %v1917_v37 }
  0x5b   :  { %169 = vadd.xlane.f32.xlu0 %v1921_v38  ;;  %171 = vadd.xlane.f32.xlu1 %v1923_v39 }
  0x5f   :  { %173 = vadd.xlane.f32.xlu0 %v1927_v40  ;;  %175 = vadd.xlane.f32.xlu1 %v1929_v41 }
  0x63   :  { %177 = vadd.xlane.f32.xlu0 %v1933_v42  ;;  %179 = vadd.xlane.f32.xlu1 %v1935_v43 }
  0x67   :  { %181 = vadd.xlane.f32.xlu0 %v1939_v44  ;;  %183 = vadd.xlane.f32.xlu1 %v1941_v45 }
  0x6b   :  { %185 = vadd.xlane.f32.xlu0 %v1945_v46  ;;  %187 = vadd.xlane.f32.xlu1 %v1947_v47 }
  0x6f   :  { %189 = vadd.xlane.f32.xlu0 %v1951_v48  ;;  %191 = vadd.xlane.f32.xlu1 %v1953_v49 }
  0x73   :  { %193 = vadd.xlane.f32.xlu0 %v1957_v50  ;;  %195 = vadd.xlane.f32.xlu1 %v1959_v51 }
  0x77   :  { %197 = vadd.xlane.f32.xlu0 %v1963_v52  ;;  %199 = vadd.xlane.f32.xlu1 %v1965_v53 }
  0x7b   :  { %201 = vadd.xlane.f32.xlu0 %v1969_v54  ;;  %203 = vadd.xlane.f32.xlu1 %v1971_v55 }
  0x7f   :  { %205 = vadd.xlane.f32.xlu0 %v1975_v56  ;;  %207 = vadd.xlane.f32.xlu1 %v1977_v57 }
  0x83   :  { %209 = vadd.xlane.f32.xlu0 %v1981_v58  ;;  %211 = vadd.xlane.f32.xlu1 %v1983_v59 }
  0x87   :  { %213 = vadd.xlane.f32.xlu0 %v1987_v60  ;;  %215 = vadd.xlane.f32.xlu1 %v1989_v61 }
  0x8b   :  { %217 = vadd.xlane.f32.xlu0 %v1993_v62  ;;  %219 = vadd.xlane.f32.xlu1 %v1995_v63 }
  0x98   :  { %v94_v57 = vpop.xlane.xlu0 %93  ;;  %v98_v58 = vpop.xlane.xlu1 %97 }
  0x99   :  { %v222_v56 = vmul.f32 0.0078125, %v94_v57  ;;  %v224_v59 = vmul.f32 0.0078125, %v98_v58 }
  0x9b   :  { %v2000_v55 = vsub.f32 %v1807_v0, %v222_v56  ;;  %v2003_v54 = vsub.f32 %v1809_v1, %v224_v59 }
  0x9c   :  { %v96_v60 = vpop.xlane.xlu0 %95  ;;  %v100_v61 = vpop.xlane.xlu1 %99 }
  0x9d   :  { %2567 = vst [vmem:[#allocation20_spill] sm:$0xff] %v2003_v54  ;;  %v223_v53 = vmul.f32 0.0078125, %v96_v60  ;;  %v350_v52 = vmul.f32 %v2000_v55, %v2000_v55  ;;  %v225_v51 = vmul.f32 0.0078125, %v100_v61  ;;  %v352_v63 = vmul.f32 %v2003_v54, %v2003_v54 }
  0x9f   :  { %414 = vadd.xlane.f32.xlu0 %v350_v52  ;;  %v2010_v57 = vsub.f32 %v1813_v2, %v223_v53  ;;  %v2013_v0 = vsub.f32 %v1815_v3, %v225_v51 }
  0xa0   :  { %v102_v56 = vpop.xlane.xlu0 %101  ;;  %v104_v1 = vpop.xlane.xlu1 %103 }
  0xa1   :  { %v226_v58 = vmul.f32 0.0078125, %v102_v56  ;;  %v351_v59 = vmul.f32 %v2010_v57, %v2010_v57  ;;  %v227_v60 = vmul.f32 0.0078125, %v104_v1  ;;  %v353_v52 = vmul.f32 %v2013_v0, %v2013_v0 }
  0xa3   :  { %418 = vadd.xlane.f32.xlu0 %v352_v63  ;;  %416 = vadd.xlane.f32.xlu1 %v351_v59  ;;  %v2020_v61 = vsub.f32 %v1819_v4, %v226_v58  ;;  %v2023_v2 = vsub.f32 %v1821_v5, %v227_v60 }
  0xa4   :  { %v106_v3 = vpop.xlane.xlu0 %105  ;;  %v108_v51 = vpop.xlane.xlu1 %107 }
  0xa5   :  { %v228_v53 = vmul.f32 0.0078125, %v106_v3  ;;  %v354_v56 = vmul.f32 %v2020_v61, %v2020_v61  ;;  %v229_v54 = vmul.f32 0.0078125, %v108_v51  ;;  %v355_v63 = vmul.f32 %v2023_v2, %v2023_v2 }
  0xa7   :  { %420 = vadd.xlane.f32.xlu1 %v353_v52  ;;  %422 = vadd.xlane.f32.xlu0 %v354_v56  ;;  %v2030_v1 = vsub.f32 %v1825_v6, %v228_v53  ;;  %v2033_v4 = vsub.f32 %v1827_v7, %v229_v54 }
  0xa8   :  { %v110_v5 = vpop.xlane.xlu0 %109  ;;  %v112_v58 = vpop.xlane.xlu1 %111 }
  0xa9   :  { %v230_v59 = vmul.f32 0.0078125, %v110_v5  ;;  %v356_v60 = vmul.f32 %v2030_v1, %v2030_v1  ;;  %v231_v3 = vmul.f32 0.0078125, %v112_v58  ;;  %v357_v52 = vmul.f32 %v2033_v4, %v2033_v4 }
  0xab   :  { %424 = vadd.xlane.f32.xlu1 %v355_v63  ;;  %426 = vadd.xlane.f32.xlu0 %v356_v60  ;;  %v2040_v51 = vsub.f32 %v1831_v8, %v230_v59  ;;  %v2043_v6 = vsub.f32 %v1833_v9, %v231_v3 }
  0xac   :  { %v114_v7 = vpop.xlane.xlu0 %113  ;;  %v116_v54 = vpop.xlane.xlu1 %115 }
  0xad   :  { %v232_v53 = vmul.f32 0.0078125, %v114_v7  ;;  %v358_v56 = vmul.f32 %v2040_v51, %v2040_v51  ;;  %v233_v5 = vmul.f32 0.0078125, %v116_v54  ;;  %v359_v63 = vmul.f32 %v2043_v6, %v2043_v6 }
  0xaf   :  { %428 = vadd.xlane.f32.xlu1 %v357_v52  ;;  %430 = vadd.xlane.f32.xlu0 %v358_v56  ;;  %v2050_v58 = vsub.f32 %v1837_v10, %v232_v53  ;;  %v2053_v8 = vsub.f32 %v1839_v11, %v233_v5 }
  0xb0   :  { %v118_v9 = vpop.xlane.xlu0 %117  ;;  %v120_v59 = vpop.xlane.xlu1 %119 }
  0xb1   :  { %v234_v60 = vmul.f32 0.0078125, %v118_v9  ;;  %v360_v3 = vmul.f32 %v2050_v58, %v2050_v58  ;;  %v235_v7 = vmul.f32 0.0078125, %v120_v59  ;;  %v361_v52 = vmul.f32 %v2053_v8, %v2053_v8 }
  0xb3   :  { %432 = vadd.xlane.f32.xlu1 %v359_v63  ;;  %434 = vadd.xlane.f32.xlu0 %v360_v3  ;;  %v2060_v54 = vsub.f32 %v1843_v12, %v234_v60  ;;  %v2063_v10 = vsub.f32 %v1845_v13, %v235_v7 }
  0xb4   :  { %v122_v11 = vpop.xlane.xlu0 %121  ;;  %v124_v53 = vpop.xlane.xlu1 %123 }
  0xb5   :  { %v236_v56 = vmul.f32 0.0078125, %v122_v11  ;;  %v362_v5 = vmul.f32 %v2060_v54, %v2060_v54  ;;  %v237_v9 = vmul.f32 0.0078125, %v124_v53  ;;  %v363_v63 = vmul.f32 %v2063_v10, %v2063_v10 }
  0xb7   :  { %436 = vadd.xlane.f32.xlu1 %v361_v52  ;;  %438 = vadd.xlane.f32.xlu0 %v362_v5  ;;  %v2070_v59 = vsub.f32 %v1849_v14, %v236_v56  ;;  %v2073_v12 = vsub.f32 %v1851_v15, %v237_v9 }
  0xb8   :  { %v126_v13 = vpop.xlane.xlu0 %125  ;;  %v128_v60 = vpop.xlane.xlu1 %127 }
  0xb9   :  { %v238_v3 = vmul.f32 0.0078125, %v126_v13  ;;  %v364_v7 = vmul.f32 %v2070_v59, %v2070_v59  ;;  %v239_v11 = vmul.f32 0.0078125, %v128_v60  ;;  %v365_v52 = vmul.f32 %v2073_v12, %v2073_v12 }
  0xbb   :  { %440 = vadd.xlane.f32.xlu1 %v363_v63  ;;  %442 = vadd.xlane.f32.xlu0 %v364_v7  ;;  %v2080_v53 = vsub.f32 %v1855_v16, %v238_v3  ;;  %v2083_v14 = vsub.f32 %v1857_v17, %v239_v11 }
  0xbc   :  { %v130_v15 = vpop.xlane.xlu0 %129  ;;  %v132_v56 = vpop.xlane.xlu1 %131 }
  0xbd   :  { %v240_v5 = vmul.f32 0.0078125, %v130_v15  ;;  %v366_v9 = vmul.f32 %v2080_v53, %v2080_v53  ;;  %v241_v13 = vmul.f32 0.0078125, %v132_v56  ;;  %v367_v63 = vmul.f32 %v2083_v14, %v2083_v14 }
  0xbf   :  { %444 = vadd.xlane.f32.xlu1 %v365_v52  ;;  %446 = vadd.xlane.f32.xlu0 %v366_v9  ;;  %v2090_v60 = vsub.f32 %v1861_v18, %v240_v5  ;;  %v2093_v16 = vsub.f32 %v1863_v19, %v241_v13 }
  0xc0   :  { %v134_v17 = vpop.xlane.xlu0 %133  ;;  %v136_v3 = vpop.xlane.xlu1 %135 }
  0xc1   :  { %v242_v7 = vmul.f32 0.0078125, %v134_v17  ;;  %v368_v11 = vmul.f32 %v2090_v60, %v2090_v60  ;;  %v243_v15 = vmul.f32 0.0078125, %v136_v3  ;;  %v369_v52 = vmul.f32 %v2093_v16, %v2093_v16 }
  0xc3   :  { %448 = vadd.xlane.f32.xlu1 %v367_v63  ;;  %450 = vadd.xlane.f32.xlu0 %v368_v11  ;;  %v2100_v56 = vsub.f32 %v1867_v20, %v242_v7  ;;  %v2103_v18 = vsub.f32 %v1869_v21, %v243_v15 }
  0xc4   :  { %v138_v19 = vpop.xlane.xlu0 %137  ;;  %v140_v5 = vpop.xlane.xlu1 %139 }
  0xc5   :  { %v244_v9 = vmul.f32 0.0078125, %v138_v19  ;;  %v370_v13 = vmul.f32 %v2100_v56, %v2100_v56  ;;  %v245_v17 = vmul.f32 0.0078125, %v140_v5  ;;  %v371_v63 = vmul.f32 %v2103_v18, %v2103_v18 }
  0xc7   :  { %452 = vadd.xlane.f32.xlu1 %v369_v52  ;;  %454 = vadd.xlane.f32.xlu0 %v370_v13  ;;  %v2110_v3 = vsub.f32 %v1873_v22, %v244_v9  ;;  %v2113_v20 = vsub.f32 %v1875_v23, %v245_v17 }
  0xc8   :  { %v142_v21 = vpop.xlane.xlu0 %141  ;;  %v144_v7 = vpop.xlane.xlu1 %143 }
  0xc9   :  { %v246_v11 = vmul.f32 0.0078125, %v142_v21  ;;  %v372_v15 = vmul.f32 %v2110_v3, %v2110_v3  ;;  %v247_v19 = vmul.f32 0.0078125, %v144_v7  ;;  %v373_v52 = vmul.f32 %v2113_v20, %v2113_v20 }
  0xcb   :  { %456 = vadd.xlane.f32.xlu1 %v371_v63  ;;  %458 = vadd.xlane.f32.xlu0 %v372_v15  ;;  %v2120_v5 = vsub.f32 %v1879_v24, %v246_v11  ;;  %v2123_v22 = vsub.f32 %v1881_v25, %v247_v19 }
  0xcc   :  { %v146_v23 = vpop.xlane.xlu0 %145  ;;  %v148_v9 = vpop.xlane.xlu1 %147 }
  0xcd   :  { %v248_v13 = vmul.f32 0.0078125, %v146_v23  ;;  %v374_v17 = vmul.f32 %v2120_v5, %v2120_v5  ;;  %v249_v21 = vmul.f32 0.0078125, %v148_v9  ;;  %v375_v63 = vmul.f32 %v2123_v22, %v2123_v22 }
  0xcf   :  { %460 = vadd.xlane.f32.xlu1 %v373_v52  ;;  %462 = vadd.xlane.f32.xlu0 %v374_v17  ;;  %v2130_v7 = vsub.f32 %v1885_v26, %v248_v13  ;;  %v2133_v24 = vsub.f32 %v1887_v27, %v249_v21 }
  0xd0   :  { %v150_v25 = vpop.xlane.xlu0 %149  ;;  %v152_v11 = vpop.xlane.xlu1 %151 }
  0xd1   :  { %v250_v15 = vmul.f32 0.0078125, %v150_v25  ;;  %v376_v19 = vmul.f32 %v2130_v7, %v2130_v7  ;;  %v251_v23 = vmul.f32 0.0078125, %v152_v11  ;;  %v377_v52 = vmul.f32 %v2133_v24, %v2133_v24 }
  0xd3   :  { %464 = vadd.xlane.f32.xlu1 %v375_v63  ;;  %466 = vadd.xlane.f32.xlu0 %v376_v19  ;;  %v2140_v9 = vsub.f32 %v1891_v28, %v250_v15  ;;  %v2143_v26 = vsub.f32 %v1893_v29, %v251_v23 }
  0xd4   :  { %v154_v27 = vpop.xlane.xlu0 %153  ;;  %v156_v13 = vpop.xlane.xlu1 %155 }
  0xd5   :  { %v252_v17 = vmul.f32 0.0078125, %v154_v27  ;;  %v378_v21 = vmul.f32 %v2140_v9, %v2140_v9  ;;  %v253_v25 = vmul.f32 0.0078125, %v156_v13  ;;  %v379_v28 = vmul.f32 %v2143_v26, %v2143_v26 }
  0xd7   :  { %v2148_v11 = vsub.f32 %v1897_v30, %v252_v17  ;;  %468 = vadd.xlane.f32.xlu1 %v377_v52  ;;  %470 = vadd.xlane.f32.xlu0 %v378_v21  ;;  %v2151_v63 = vsub.f32 %v1899_v31, %v253_v25 }
  0xd8   :  { %v158_v29 = vpop.xlane.xlu0 %157  ;;  %v160_v15 = vpop.xlane.xlu1 %159 }
  0xd9   :  { %v254_v19 = vmul.f32 0.0078125, %v158_v29  ;;  %v380_v23 = vmul.f32 %v2148_v11, %v2148_v11  ;;  %v255_v27 = vmul.f32 0.0078125, %v160_v15  ;;  %v381_v31 = vmul.f32 %v2151_v63, %v2151_v63 }
  0xdb   :  { %v2158_v13 = vsub.f32 %v1903_v32, %v254_v19  ;;  %472 = vadd.xlane.f32.xlu1 %v379_v28  ;;  %474 = vadd.xlane.f32.xlu0 %v380_v23  ;;  %v2161_v30 = vsub.f32 %v1905_v33, %v255_v27 }
  0xdc   :  { %v162_v52 = vpop.xlane.xlu0 %161  ;;  %v164_v17 = vpop.xlane.xlu1 %163 }
  0xdd   :  { %v256_v21 = vmul.f32 0.0078125, %v162_v52  ;;  %v382_v25 = vmul.f32 %v2158_v13, %v2158_v13  ;;  %v257_v29 = vmul.f32 0.0078125, %v164_v17  ;;  %v383_v33 = vmul.f32 %v2161_v30, %v2161_v30 }
  0xdf   :  { %v2168_v15 = vsub.f32 %v1909_v34, %v256_v21  ;;  %476 = vadd.xlane.f32.xlu1 %v381_v31  ;;  %478 = vadd.xlane.f32.xlu0 %v382_v25  ;;  %v2171_v32 = vsub.f32 %v1911_v35, %v257_v29 }
  0xe0   :  { %v166_v28 = vpop.xlane.xlu0 %165  ;;  %v168_v19 = vpop.xlane.xlu1 %167 }
  0xe1   :  { %v258_v23 = vmul.f32 0.0078125, %v166_v28  ;;  %v384_v27 = vmul.f32 %v2168_v15, %v2168_v15  ;;  %v259_v52 = vmul.f32 0.0078125, %v168_v19  ;;  %v385_v35 = vmul.f32 %v2171_v32, %v2171_v32 }
  0xe3   :  { %v2178_v17 = vsub.f32 %v1915_v36, %v258_v23  ;;  %480 = vadd.xlane.f32.xlu1 %v383_v33  ;;  %482 = vadd.xlane.f32.xlu0 %v384_v27  ;;  %v2181_v34 = vsub.f32 %v1917_v37, %v259_v52 }
  0xe4   :  { %v170_v31 = vpop.xlane.xlu0 %169  ;;  %v172_v21 = vpop.xlane.xlu1 %171 }
  0xe5   :  { %v260_v25 = vmul.f32 0.0078125, %v170_v31  ;;  %v386_v29 = vmul.f32 %v2178_v17, %v2178_v17  ;;  %v261_v28 = vmul.f32 0.0078125, %v172_v21  ;;  %v387_v37 = vmul.f32 %v2181_v34, %v2181_v34 }
  0xe7   :  { %v2188_v19 = vsub.f32 %v1921_v38, %v260_v25  ;;  %484 = vadd.xlane.f32.xlu1 %v385_v35  ;;  %486 = vadd.xlane.f32.xlu0 %v386_v29  ;;  %v2191_v36 = vsub.f32 %v1923_v39, %v261_v28 }
  0xe8   :  { %v174_v33 = vpop.xlane.xlu0 %173  ;;  %v176_v23 = vpop.xlane.xlu1 %175 }
  0xe9   :  { %v262_v27 = vmul.f32 0.0078125, %v174_v33  ;;  %v388_v52 = vmul.f32 %v2188_v19, %v2188_v19  ;;  %v263_v31 = vmul.f32 0.0078125, %v176_v23  ;;  %v389_v39 = vmul.f32 %v2191_v36, %v2191_v36 }
  0xeb   :  { %v2198_v21 = vsub.f32 %v1927_v40, %v262_v27  ;;  %488 = vadd.xlane.f32.xlu1 %v387_v37  ;;  %490 = vadd.xlane.f32.xlu0 %v388_v52  ;;  %v2201_v38 = vsub.f32 %v1929_v41, %v263_v31 }
  0xec   :  { %v178_v35 = vpop.xlane.xlu0 %177  ;;  %v180_v25 = vpop.xlane.xlu1 %179 }
  0xed   :  { %v264_v29 = vmul.f32 0.0078125, %v178_v35  ;;  %v390_v28 = vmul.f32 %v2198_v21, %v2198_v21  ;;  %v265_v33 = vmul.f32 0.0078125, %v180_v25  ;;  %v391_v41 = vmul.f32 %v2201_v38, %v2201_v38 }
  0xef   :  { %v2208_v23 = vsub.f32 %v1933_v42, %v264_v29  ;;  %492 = vadd.xlane.f32.xlu1 %v389_v39  ;;  %494 = vadd.xlane.f32.xlu0 %v390_v28  ;;  %v2211_v40 = vsub.f32 %v1935_v43, %v265_v33 }
  0xf0   :  { %v182_v37 = vpop.xlane.xlu0 %181  ;;  %v184_v27 = vpop.xlane.xlu1 %183 }
  0xf1   :  { %v266_v52 = vmul.f32 0.0078125, %v182_v37  ;;  %v392_v31 = vmul.f32 %v2208_v23, %v2208_v23  ;;  %v267_v35 = vmul.f32 0.0078125, %v184_v27  ;;  %v393_v43 = vmul.f32 %v2211_v40, %v2211_v40 }
  0xf3   :  { %v2218_v25 = vsub.f32 %v1939_v44, %v266_v52  ;;  %496 = vadd.xlane.f32.xlu1 %v391_v41  ;;  %498 = vadd.xlane.f32.xlu0 %v392_v31  ;;  %v2221_v42 = vsub.f32 %v1941_v45, %v267_v35 }
  0xf4   :  { %v186_v39 = vpop.xlane.xlu0 %185  ;;  %v188_v29 = vpop.xlane.xlu1 %187 }
  0xf5   :  { %2568 = vst [vmem:[#allocation21_spill] sm:$0xff] %v2218_v25  ;;  %2569 = vst [vmem:[#allocation22_spill] sm:$0xff] %v2221_v42  ;;  %v268_v28 = vmul.f32 0.0078125, %v186_v39  ;;  %v394_v33 = vmul.f32 %v2218_v25, %v2218_v25  ;;  %v269_v37 = vmul.f32 0.0078125, %v188_v29  ;;  %v395_v45 = vmul.f32 %v2221_v42, %v2221_v42 }
  0xf7   :  { %v2228_v27 = vsub.f32 %v1945_v46, %v268_v28  ;;  %500 = vadd.xlane.f32.xlu1 %v393_v43  ;;  %502 = vadd.xlane.f32.xlu0 %v394_v33  ;;  %v2231_v44 = vsub.f32 %v1947_v47, %v269_v37 }
  0xf8   :  { %v190_v41 = vpop.xlane.xlu0 %189  ;;  %v192_v52 = vpop.xlane.xlu1 %191 }
  0xf9   :  { %2570 = vst [vmem:[#allocation23_spill] sm:$0xff] %v2228_v27  ;;  %2571 = vst [vmem:[#allocation24_spill] sm:$0xff] %v2231_v44  ;;  %v270_v31 = vmul.f32 0.0078125, %v190_v41  ;;  %v396_v35 = vmul.f32 %v2228_v27, %v2228_v27  ;;  %v271_v39 = vmul.f32 0.0078125, %v192_v52  ;;  %v397_v47 = vmul.f32 %v2231_v44, %v2231_v44 }
  0xfb   :  { %v2238_v29 = vsub.f32 %v1951_v48, %v270_v31  ;;  %504 = vadd.xlane.f32.xlu1 %v395_v45  ;;  %506 = vadd.xlane.f32.xlu0 %v396_v35  ;;  %v2241_v46 = vsub.f32 %v1953_v49, %v271_v39  ;;  %v2575_v48 = vld [vmem:[#allocation8_spill] sm:$0xff] }
  0xfc   :  { %v194_v43 = vpop.xlane.xlu0 %193  ;;  %v196_v28 = vpop.xlane.xlu1 %195 }
  0xfd   :  { %2572 = vst [vmem:[#allocation25_spill] sm:$0xff] %v2238_v29  ;;  %2573 = vst [vmem:[#allocation26_spill] sm:$0xff] %v2241_v46  ;;  %v272_v33 = vmul.f32 0.0078125, %v194_v43  ;;  %v398_v37 = vmul.f32 %v2238_v29, %v2238_v29  ;;  %v273_v41 = vmul.f32 0.0078125, %v196_v28  ;;  %v399_v49 = vmul.f32 %v2241_v46, %v2241_v46  ;;  %v2577_v29 = vld [vmem:[#allocation9_spill] sm:$0xff] }
  0xff   :  { %v2248_v52 = vsub.f32 %v1957_v50, %v272_v33  ;;  %508 = vadd.xlane.f32.xlu1 %v397_v47  ;;  %510 = vadd.xlane.f32.xlu0 %v398_v37  ;;  %v2251_v45 = vsub.f32 %v2575_v48, %v273_v41  ;;  %v2579_v50 = vld [vmem:[#allocation10_spill] sm:$0xff] }
 0x100   :  { %v198_v31 = vpop.xlane.xlu0 %197  ;;  %v200_v35 = vpop.xlane.xlu1 %199 }
 0x101   :  { %2574 = vst [vmem:[#allocation27_spill] sm:$0xff] %v2248_v52  ;;  %2576 = vst [vmem:[#allocation8_spill] sm:$0xff] %v2251_v45  ;;  %v274_v39 = vmul.f32 0.0078125, %v198_v31  ;;  %v400_v43 = vmul.f32 %v2248_v52, %v2248_v52  ;;  %v275_v44 = vmul.f32 0.0078125, %v200_v35  ;;  %v401_v33 = vmul.f32 %v2251_v45, %v2251_v45  ;;  %v2581_v52 = vld [vmem:[#allocation11_spill] sm:$0xff] }
 0x103   :  { %v2258_v28 = vsub.f32 %v2577_v29, %v274_v39  ;;  %512 = vadd.xlane.f32.xlu1 %v399_v49  ;;  %514 = vadd.xlane.f32.xlu0 %v400_v43  ;;  %v2261_v47 = vsub.f32 %v2579_v50, %v275_v44  ;;  %v2583_v29 = vld [vmem:[#allocation12_spill] sm:$0xff] }
 0x104   :  { %v202_v37 = vpop.xlane.xlu0 %201  ;;  %v204_v41 = vpop.xlane.xlu1 %203 }
 0x105   :  { %2578 = vst [vmem:[#allocation9_spill] sm:$0xff] %v2258_v28  ;;  %2580 = vst [vmem:[#allocation10_spill] sm:$0xff] %v2261_v47  ;;  %v276_v48 = vmul.f32 0.0078125, %v202_v37  ;;  %v402_v31 = vmul.f32 %v2258_v28, %v2258_v28  ;;  %v277_v46 = vmul.f32 0.0078125, %v204_v41  ;;  %v403_v44 = vmul.f32 %v2261_v47, %v2261_v47  ;;  %v2585_v28 = vld [vmem:[#allocation13_spill] sm:$0xff] }
 0x107   :  { %v2268_v35 = vsub.f32 %v2581_v52, %v276_v48  ;;  %516 = vadd.xlane.f32.xlu1 %v401_v33  ;;  %518 = vadd.xlane.f32.xlu0 %v402_v31  ;;  %v2271_v49 = vsub.f32 %v2583_v29, %v277_v46  ;;  %v2587_v52 = vld [vmem:[#allocation14_spill] sm:$0xff] }
 0x108   :  { %v206_v39 = vpop.xlane.xlu0 %205  ;;  %v208_v43 = vpop.xlane.xlu1 %207 }
 0x109   :  { %2582 = vst [vmem:[#allocation11_spill] sm:$0xff] %v2268_v35  ;;  %2584 = vst [vmem:[#allocation12_spill] sm:$0xff] %v2271_v49  ;;  %v278_v50 = vmul.f32 0.0078125, %v206_v39  ;;  %v404_v37 = vmul.f32 %v2268_v35, %v2268_v35  ;;  %v279_v45 = vmul.f32 0.0078125, %v208_v43  ;;  %v405_v46 = vmul.f32 %v2271_v49, %v2271_v49  ;;  %v2589_v35 = vld [vmem:[#allocation15_spill] sm:$0xff] }
 0x10b   :  { %v2278_v41 = vsub.f32 %v2585_v28, %v278_v50  ;;  %520 = vadd.xlane.f32.xlu1 %v403_v44  ;;  %522 = vadd.xlane.f32.xlu0 %v404_v37  ;;  %v2281_v33 = vsub.f32 %v2587_v52, %v279_v45  ;;  %v2591_v28 = vld [vmem:[#allocation16_spill] sm:$0xff] }
 0x10c   :  { %v210_v48 = vpop.xlane.xlu0 %209  ;;  %v212_v31 = vpop.xlane.xlu1 %211 }
 0x10d   :  { %2586 = vst [vmem:[#allocation13_spill] sm:$0xff] %v2278_v41  ;;  %2588 = vst [vmem:[#allocation14_spill] sm:$0xff] %v2281_v33  ;;  %v280_v29 = vmul.f32 0.0078125, %v210_v48  ;;  %v406_v39 = vmul.f32 %v2278_v41, %v2278_v41  ;;  %v281_v47 = vmul.f32 0.0078125, %v212_v31  ;;  %v407_v45 = vmul.f32 %v2281_v33, %v2281_v33  ;;  %v2593_v41 = vld [vmem:[#allocation17_spill] sm:$0xff] }
 0x10f   :  { %v2288_v43 = vsub.f32 %v2589_v35, %v280_v29  ;;  %524 = vadd.xlane.f32.xlu1 %v405_v46  ;;  %526 = vadd.xlane.f32.xlu0 %v406_v39  ;;  %v2291_v44 = vsub.f32 %v2591_v28, %v281_v47  ;;  %v2595_v35 = vld [vmem:[#allocation18_spill] sm:$0xff] }
 0x110   :  { %v214_v50 = vpop.xlane.xlu0 %213  ;;  %v216_v37 = vpop.xlane.xlu1 %215 }
 0x111   :  { %2590 = vst [vmem:[#allocation15_spill] sm:$0xff] %v2288_v43  ;;  %2592 = vst [vmem:[#allocation16_spill] sm:$0xff] %v2291_v44  ;;  %v282_v52 = vmul.f32 0.0078125, %v214_v50  ;;  %v408_v48 = vmul.f32 %v2288_v43, %v2288_v43  ;;  %v283_v49 = vmul.f32 0.0078125, %v216_v37  ;;  %v409_v47 = vmul.f32 %v2291_v44, %v2291_v44 }
 0x113   :  { %v2298_v31 = vsub.f32 %v2593_v41, %v282_v52  ;;  %528 = vadd.xlane.f32.xlu1 %v407_v45  ;;  %530 = vadd.xlane.f32.xlu0 %v408_v48  ;;  %v2301_v46 = vsub.f32 %v2595_v35, %v283_v49  ;;  %v2598_v41 = vld [vmem:[#allocation19_spill] sm:$0xff] }
 0x114   :  { %v218_v29 = vpop.xlane.xlu0 %217  ;;  %v220_v39 = vpop.xlane.xlu1 %219 }
 0x115   :  { %2594 = vst [vmem:[#allocation17_spill] sm:$0xff] %v2298_v31  ;;  %2596 = vst [vmem:[#allocation18_spill] sm:$0xff] %v2301_v46  ;;  %v284_v28 = vmul.f32 0.0078125, %v218_v29  ;;  %v410_v50 = vmul.f32 %v2298_v31, %v2298_v31  ;;  %v285_v33 = vmul.f32 0.0078125, %v220_v39  ;;  %v411_v49 = vmul.f32 %v2301_v46, %v2301_v46 }
 0x117   :  { %v2308_v37 = vsub.f32 %v1993_v62, %v284_v28  ;;  %532 = vadd.xlane.f32.xlu1 %v409_v47  ;;  %534 = vadd.xlane.f32.xlu0 %v410_v50  ;;  %v2311_v45 = vsub.f32 %v2598_v41, %v285_v33 }
 0x119   :  { %2597 = vst [vmem:[#allocation28_spill] sm:$0xff] %v2308_v37  ;;  %2599 = vst [vmem:[#allocation19_spill] sm:$0xff] %v2311_v45  ;;  %v412_v52 = vmul.f32 %v2308_v37, %v2308_v37  ;;  %v413_v48 = vmul.f32 %v2311_v45, %v2311_v45 }
 0x11b   :  { %536 = vadd.xlane.f32.xlu1 %v411_v49  ;;  %538 = vadd.xlane.f32.xlu0 %v412_v52 }
 0x11f   :  { %540 = vadd.xlane.f32.xlu1 %v413_v48 }
 0x128   :  { %v415_v35 = vpop.xlane.xlu0 %414 }
 0x129   :  { %v542_v62 = vmul.f32 0.0078125, %v415_v35 }
 0x12b   :  { %v606_v29 = vadd.f32 1e-12, %v542_v62 }
 0x12c   :  { %v417_v47 = vpop.xlane.xlu1 %416  ;;  %v419_v39 = vpop.xlane.xlu0 %418 }
 0x12d   :  { %1604 = vrsqrt.f32 %v606_v29  ;;  %v543_v33 = vmul.f32 0.0078125, %v417_v47  ;;  %v544_v28 = vmul.f32 0.0078125, %v419_v39 }
 0x12f   :  { %v607_v50 = vadd.f32 1e-12, %v543_v33  ;;  %v608_v41 = vadd.f32 1e-12, %v544_v28 }
 0x130   :  { %v421_v46 = vpop.xlane.xlu1 %420  ;;  %v423_v31 = vpop.xlane.xlu0 %422 }
 0x131   :  { %1606 = vrsqrt.f32 %v607_v50  ;;  %v545_v37 = vmul.f32 0.0078125, %v421_v46  ;;  %v546_v49 = vmul.f32 0.0078125, %v423_v31  ;;  %v2322_v31 = vld [vmem:[%s2519_s1] ss:$0 sm:$0xff] }
 0x132   :  { %1608 = vrsqrt.f32 %v608_v41 }
 0x133   :  { %v609_v52 = vadd.f32 1e-12, %v545_v37  ;;  %v610_v44 = vadd.f32 1e-12, %v546_v49 }
 0x134   :  { %v425_v45 = vpop.xlane.xlu1 %424  ;;  %v427_v48 = vpop.xlane.xlu0 %426 }
 0x135   :  { %1610 = vrsqrt.f32 %v609_v52  ;;  %v547_v35 = vmul.f32 0.0078125, %v425_v45  ;;  %v548_v62 = vmul.f32 0.0078125, %v427_v48 }
 0x136   :  { %1612 = vrsqrt.f32 %v610_v44 }
 0x137   :  { %v611_v43 = vadd.f32 1e-12, %v547_v35  ;;  %v612_v29 = vadd.f32 1e-12, %v548_v62  ;;  %v2329_v35 = vld [vmem:[%s2520_s2] ss:$0 sm:$0xff] }
 0x138   :  { %v429_v47 = vpop.xlane.xlu1 %428  ;;  %v431_v39 = vpop.xlane.xlu0 %430 }
 0x139   :  { %1614 = vrsqrt.f32 %v611_v43  ;;  %v549_v33 = vmul.f32 0.0078125, %v429_v47  ;;  %v550_v28 = vmul.f32 0.0078125, %v431_v39 }
 0x13a   :  { %v1605_v27 = vpop.eup %1604  ;;  %1616 = vrsqrt.f32 %v612_v29  ;;  %v2600_v29 = vld [vmem:[#allocation20_spill] sm:$0xff] }
 0x13b   :  { %v734_v46 = vmul.f32 %v1605_v27, %v2000_v55  ;;  %v613_v37 = vadd.f32 1e-12, %v549_v33  ;;  %v614_v45 = vadd.f32 1e-12, %v550_v28 }
 0x13c   :  { %v433_v50 = vpop.xlane.xlu1 %432  ;;  %v435_v44 = vpop.xlane.xlu0 %434 }
 0x13d   :  { %1618 = vrsqrt.f32 %v613_v37  ;;  %v551_v41 = vmul.f32 0.0078125, %v433_v50  ;;  %v552_v49 = vmul.f32 0.0078125, %v435_v44  ;;  %v805_v43 = vmul.f32 %v2322_v31, %v734_v46 }
 0x13e   :  { %v1607_v52 = vpop.eup %1606  ;;  %1620 = vrsqrt.f32 %v614_v45 }
 0x13f   :  { %v1609_v48 = vpop.eup %1608  ;;  %v735_v62 = vmul.f32 %v1607_v52, %v2010_v57  ;;  %v615_v55 = vadd.f32 1e-12, %v551_v41  ;;  %v616_v27 = vadd.f32 1e-12, %v552_v49  ;;  %v876_v50 = vadd.f32 %v2329_v35, %v805_v43 }
 0x140   :  { %v736_v47 = vmul.f32 %v1609_v48, %v2600_v29  ;;  %v437_v39 = vpop.xlane.xlu1 %436  ;;  %v439_v33 = vpop.xlane.xlu0 %438 }
 0x141   :  { %v806_v28 = vmul.f32 %v2322_v31, %v735_v62  ;;  %1622 = vrsqrt.f32 %v615_v55  ;;  %v553_v37 = vmul.f32 0.0078125, %v437_v39  ;;  %v554_v46 = vmul.f32 0.0078125, %v439_v33 }
 0x142   :  { %v1611_v45 = vpop.eup %1610  ;;  %v807_v44 = vmul.f32 %v2322_v31, %v736_v47  ;;  %1624 = vrsqrt.f32 %v616_v27 }
 0x143   :  { %v1613_v42 = vpop.eup %1612  ;;  %v877_v57 = vadd.f32 %v2329_v35, %v806_v28  ;;  %v737_v41 = vmul.f32 %v1611_v45, %v2013_v0  ;;  %v617_v49 = vadd.f32 1e-12, %v553_v37  ;;  %v618_v52 = vadd.f32 1e-12, %v554_v46 }
 0x144   :  { %v738_v48 = vmul.f32 %v1613_v42, %v2020_v61  ;;  %v441_v29 = vpop.xlane.xlu1 %440  ;;  %v443_v62 = vpop.xlane.xlu0 %442  ;;  %v878_v0 = vadd.f32 %v2329_v35, %v807_v44 }
 0x145   :  { %v1410_v55 = vpack.c.bf16 %v877_v57, %v876_v50  ;;  %v808_v39 = vmul.f32 %v2322_v31, %v737_v41  ;;  %1626 = vrsqrt.f32 %v617_v49  ;;  %v555_v33 = vmul.f32 0.0078125, %v441_v29 }
 0x146   :  { %v1615_v43 = vpop.eup %1614  ;;  %v809_v47 = vmul.f32 %v2322_v31, %v738_v48  ;;  %1628 = vrsqrt.f32 %v618_v52  ;;  %v556_v27 = vmul.f32 0.0078125, %v443_v62 }
 0x147   :  { %v1617_v25 = vpop.eup %1616  ;;  %1411 = vst [vmem:[#allocation5] sm:$0xff] %v1410_v55   ;;  %v879_v28 = vadd.f32 %v2329_v35, %v808_v39  ;;  %v739_v61 = vmul.f32 %v1615_v43, %v2023_v2  ;;  %v619_v42 = vadd.f32 1e-12, %v555_v33 }
 0x148   :  { %v740_v37 = vmul.f32 %v1617_v25, %v2030_v1  ;;  %v620_v46 = vadd.f32 1e-12, %v556_v27  ;;  %v445_v45 = vpop.xlane.xlu1 %444  ;;  %v447_v50 = vpop.xlane.xlu0 %446  ;;  %v880_v48 = vadd.f32 %v2329_v35, %v809_v47 }
 0x149   :  { %v1415_v57 = vpack.c.bf16 %v879_v28, %v878_v0  ;;  %v810_v41 = vmul.f32 %v2322_v31, %v739_v61  ;;  %1630 = vrsqrt.f32 %v619_v42  ;;  %v557_v49 = vmul.f32 0.0078125, %v445_v45 }
 0x14a   :  { %v1619_v52 = vpop.eup %1618  ;;  %1632 = vrsqrt.f32 %v620_v46  ;;  %v558_v44 = vmul.f32 0.0078125, %v447_v50  ;;  %v811_v62 = vmul.f32 %v2322_v31, %v740_v37 }
 0x14b   :  { %v1621_v29 = vpop.eup %1620  ;;  %1567 = vst [vmem:[#allocation5 + $0x8] sm:$0xff] %v1415_v57   ;;  %v881_v2 = vadd.f32 %v2329_v35, %v810_v41  ;;  %v741_v1 = vmul.f32 %v1619_v52, %v2033_v4  ;;  %v621_v25 = vadd.f32 1e-12, %v557_v49 }
 0x14c   :  { %v742_v55 = vmul.f32 %v1621_v29, %v2040_v51  ;;  %v622_v39 = vadd.f32 1e-12, %v558_v44  ;;  %v449_v33 = vpop.xlane.xlu1 %448  ;;  %v451_v43 = vpop.xlane.xlu0 %450  ;;  %v882_v4 = vadd.f32 %v2329_v35, %v811_v62 }
 0x14d   :  { %v1420_v27 = vpack.c.bf16 %v881_v2, %v880_v48  ;;  %v812_v0 = vmul.f32 %v2322_v31, %v741_v1  ;;  %1634 = vrsqrt.f32 %v621_v25  ;;  %v559_v47 = vmul.f32 0.0078125, %v449_v33 }
 0x14e   :  { %v1623_v28 = vpop.eup %1622  ;;  %v813_v61 = vmul.f32 %v2322_v31, %v742_v55  ;;  %1636 = vrsqrt.f32 %v622_v39  ;;  %v560_v42 = vmul.f32 0.0078125, %v451_v43 }
 0x14f   :  { %v1625_v46 = vpop.eup %1624  ;;  %1568 = vst [vmem:[#allocation5 + $0x10] sm:$0xff] %v1420_v27   ;;  %v883_v37 = vadd.f32 %v2329_v35, %v812_v0  ;;  %v743_v51 = vmul.f32 %v1623_v28, %v2043_v6  ;;  %v623_v45 = vadd.f32 1e-12, %v559_v47 }
 0x150   :  { %v744_v50 = vmul.f32 %v1625_v46, %v2050_v58  ;;  %v624_v57 = vadd.f32 1e-12, %v560_v42  ;;  %v453_v41 = vpop.xlane.xlu1 %452  ;;  %v455_v49 = vpop.xlane.xlu0 %454  ;;  %v884_v2 = vadd.f32 %v2329_v35, %v813_v61 }
 0x151   :  { %v1425_v52 = vpack.c.bf16 %v883_v37, %v882_v4  ;;  %v814_v48 = vmul.f32 %v2322_v31, %v743_v51  ;;  %1638 = vrsqrt.f32 %v623_v45  ;;  %v561_v44 = vmul.f32 0.0078125, %v453_v41 }
 0x152   :  { %v1627_v29 = vpop.eup %1626  ;;  %1640 = vrsqrt.f32 %v624_v57  ;;  %v562_v62 = vmul.f32 0.0078125, %v455_v49  ;;  %v815_v25 = vmul.f32 %v2322_v31, %v744_v50 }
 0x153   :  { %v1629_v1 = vpop.eup %1628  ;;  %1569 = vst [vmem:[#allocation5 + $0x18] sm:$0xff] %v1425_v52   ;;  %v885_v6 = vadd.f32 %v2329_v35, %v814_v48  ;;  %v745_v58 = vmul.f32 %v1627_v29, %v2053_v8  ;;  %v625_v55 = vadd.f32 1e-12, %v561_v44 }
 0x154   :  { %v746_v39 = vmul.f32 %v1629_v1, %v2060_v54  ;;  %v626_v33 = vadd.f32 1e-12, %v562_v62  ;;  %v457_v43 = vpop.xlane.xlu1 %456  ;;  %v459_v27 = vpop.xlane.xlu0 %458  ;;  %v886_v8 = vadd.f32 %v2329_v35, %v815_v25 }
 0x155   :  { %v1430_v0 = vpack.c.bf16 %v885_v6, %v884_v2  ;;  %v816_v47 = vmul.f32 %v2322_v31, %v745_v58  ;;  %1642 = vrsqrt.f32 %v625_v55  ;;  %v563_v28 = vmul.f32 0.0078125, %v457_v43 }
 0x156   :  { %v1631_v61 = vpop.eup %1630  ;;  %v817_v42 = vmul.f32 %v2322_v31, %v746_v39  ;;  %1644 = vrsqrt.f32 %v626_v33  ;;  %v564_v46 = vmul.f32 0.0078125, %v459_v27 }
 0x157   :  { %v1633_v4 = vpop.eup %1632  ;;  %1570 = vst [vmem:[#allocation5 + $0x20] sm:$0xff] %v1430_v0   ;;  %v887_v37 = vadd.f32 %v2329_v35, %v816_v47  ;;  %v747_v54 = vmul.f32 %v1631_v61, %v2063_v10  ;;  %v627_v51 = vadd.f32 1e-12, %v563_v28 }
 0x158   :  { %v748_v45 = vmul.f32 %v1633_v4, %v2070_v59  ;;  %v628_v50 = vadd.f32 1e-12, %v564_v46  ;;  %v461_v57 = vpop.xlane.xlu1 %460  ;;  %v463_v41 = vpop.xlane.xlu0 %462  ;;  %v888_v29 = vadd.f32 %v2329_v35, %v817_v42 }
 0x159   :  { %v1435_v49 = vpack.c.bf16 %v887_v37, %v886_v8  ;;  %v818_v52 = vmul.f32 %v2322_v31, %v747_v54  ;;  %1646 = vrsqrt.f32 %v627_v51  ;;  %v565_v48 = vmul.f32 0.0078125, %v461_v57 }
 0x15a   :  { %v1635_v44 = vpop.eup %1634  ;;  %1648 = vrsqrt.f32 %v628_v50  ;;  %v566_v2 = vmul.f32 0.0078125, %v463_v41  ;;  %v819_v1 = vmul.f32 %v2322_v31, %v748_v45 }
 0x15b   :  { %v1637_v62 = vpop.eup %1636  ;;  %1571 = vst [vmem:[#allocation5 + $0x28] sm:$0xff] %v1435_v49   ;;  %v889_v10 = vadd.f32 %v2329_v35, %v818_v52  ;;  %v749_v59 = vmul.f32 %v1635_v44, %v2073_v12  ;;  %v629_v6 = vadd.f32 1e-12, %v565_v48 }
 0x15c   :  { %v750_v25 = vmul.f32 %v1637_v62, %v2080_v53  ;;  %v630_v58 = vadd.f32 1e-12, %v566_v2  ;;  %v465_v55 = vpop.xlane.xlu1 %464  ;;  %v467_v39 = vpop.xlane.xlu0 %466  ;;  %v890_v12 = vadd.f32 %v2329_v35, %v819_v1 }
 0x15d   :  { %v1440_v33 = vpack.c.bf16 %v889_v10, %v888_v29  ;;  %v820_v43 = vmul.f32 %v2322_v31, %v749_v59  ;;  %1650 = vrsqrt.f32 %v629_v6  ;;  %v567_v27 = vmul.f32 0.0078125, %v465_v55 }
 0x15e   :  { %v1639_v0 = vpop.eup %1638  ;;  %v821_v47 = vmul.f32 %v2322_v31, %v750_v25  ;;  %1652 = vrsqrt.f32 %v630_v58  ;;  %v568_v28 = vmul.f32 0.0078125, %v467_v39 }
 0x15f   :  { %v1641_v61 = vpop.eup %1640  ;;  %1572 = vst [vmem:[#allocation5 + $0x30] sm:$0xff] %v1440_v33   ;;  %v891_v42 = vadd.f32 %v2329_v35, %v820_v43  ;;  %v751_v53 = vmul.f32 %v1639_v0, %v2083_v14  ;;  %v631_v46 = vadd.f32 1e-12, %v567_v27 }
 0x160   :  { %v752_v4 = vmul.f32 %v1641_v61, %v2090_v60  ;;  %v632_v8 = vadd.f32 1e-12, %v568_v28  ;;  %v469_v37 = vpop.xlane.xlu1 %468  ;;  %v471_v54 = vpop.xlane.xlu0 %470  ;;  %v892_v41 = vadd.f32 %v2329_v35, %v821_v47 }
 0x161   :  { %v1445_v51 = vpack.c.bf16 %v891_v42, %v890_v12  ;;  %v822_v45 = vmul.f32 %v2322_v31, %v751_v53  ;;  %1654 = vrsqrt.f32 %v631_v46  ;;  %v569_v50 = vmul.f32 0.0078125, %v469_v37 }
 0x162   :  { %v1643_v57 = vpop.eup %1642  ;;  %1656 = vrsqrt.f32 %v632_v8  ;;  %v570_v49 = vmul.f32 0.0078125, %v471_v54  ;;  %v823_v48 = vmul.f32 %v2322_v31, %v752_v4 }
 0x163   :  { %v1645_v52 = vpop.eup %1644  ;;  %1573 = vst [vmem:[#allocation5 + $0x38] sm:$0xff] %v1445_v51   ;;  %v893_v14 = vadd.f32 %v2329_v35, %v822_v45  ;;  %v753_v60 = vmul.f32 %v1643_v57, %v2093_v16  ;;  %v633_v44 = vadd.f32 1e-12, %v569_v50 }
 0x164   :  { %v754_v29 = vmul.f32 %v1645_v52, %v2100_v56  ;;  %v634_v2 = vadd.f32 1e-12, %v570_v49  ;;  %v473_v62 = vpop.xlane.xlu1 %472  ;;  %v475_v10 = vpop.xlane.xlu0 %474  ;;  %v894_v16 = vadd.f32 %v2329_v35, %v823_v48 }
 0x165   :  { %v1450_v1 = vpack.c.bf16 %v893_v14, %v892_v41  ;;  %v824_v59 = vmul.f32 %v2322_v31, %v753_v60  ;;  %1658 = vrsqrt.f32 %v633_v44  ;;  %v571_v6 = vmul.f32 0.0078125, %v473_v62 }
 0x166   :  { %v1647_v25 = vpop.eup %1646  ;;  %v825_v58 = vmul.f32 %v2322_v31, %v754_v29  ;;  %1660 = vrsqrt.f32 %v634_v2  ;;  %v572_v55 = vmul.f32 0.0078125, %v475_v10 }
 0x167   :  { %v1649_v39 = vpop.eup %1648  ;;  %1574 = vst [vmem:[#allocation5 + $0x40] sm:$0xff] %v1450_v1   ;;  %v895_v33 = vadd.f32 %v2329_v35, %v824_v59  ;;  %v755_v56 = vmul.f32 %v1647_v25, %v2103_v18  ;;  %v635_v43 = vadd.f32 1e-12, %v571_v6 }
 0x168   :  { %v756_v27 = vmul.f32 %v1649_v39, %v2110_v3  ;;  %v636_v0 = vadd.f32 1e-12, %v572_v55  ;;  %v477_v47 = vpop.xlane.xlu1 %476  ;;  %v479_v28 = vpop.xlane.xlu0 %478  ;;  %v896_v46 = vadd.f32 %v2329_v35, %v825_v58 }
 0x169   :  { %v1455_v61 = vpack.c.bf16 %v895_v33, %v894_v16  ;;  %v826_v12 = vmul.f32 %v2322_v31, %v755_v56  ;;  %1662 = vrsqrt.f32 %v635_v43  ;;  %v573_v42 = vmul.f32 0.0078125, %v477_v47 }
 0x16a   :  { %v1651_v53 = vpop.eup %1650  ;;  %1664 = vrsqrt.f32 %v636_v0  ;;  %v574_v4 = vmul.f32 0.0078125, %v479_v28  ;;  %v827_v37 = vmul.f32 %v2322_v31, %v756_v27 }
 0x16b   :  { %v1653_v8 = vpop.eup %1652  ;;  %1575 = vst [vmem:[#allocation5 + $0x48] sm:$0xff] %v1455_v61   ;;  %v897_v18 = vadd.f32 %v2329_v35, %v826_v12  ;;  %v757_v3 = vmul.f32 %v1651_v53, %v2113_v20  ;;  %v637_v54 = vadd.f32 1e-12, %v573_v42 }
 0x16c   :  { %v758_v51 = vmul.f32 %v1653_v8, %v2120_v5  ;;  %v638_v45 = vadd.f32 1e-12, %v574_v4  ;;  %v481_v50 = vpop.xlane.xlu1 %480  ;;  %v483_v57 = vpop.xlane.xlu0 %482  ;;  %v898_v20 = vadd.f32 %v2329_v35, %v827_v37 }
 0x16d   :  { %v1460_v41 = vpack.c.bf16 %v897_v18, %v896_v46  ;;  %v828_v49 = vmul.f32 %v2322_v31, %v757_v3  ;;  %1666 = vrsqrt.f32 %v637_v54  ;;  %v575_v52 = vmul.f32 0.0078125, %v481_v50 }
 0x16e   :  { %v1655_v14 = vpop.eup %1654  ;;  %v829_v48 = vmul.f32 %v2322_v31, %v758_v51  ;;  %1668 = vrsqrt.f32 %v638_v45  ;;  %v576_v60 = vmul.f32 0.0078125, %v483_v57 }
 0x16f   :  { %v1657_v44 = vpop.eup %1656  ;;  %1576 = vst [vmem:[#allocation5 + $0x50] sm:$0xff] %v1460_v41   ;;  %v899_v29 = vadd.f32 %v2329_v35, %v828_v49  ;;  %v759_v5 = vmul.f32 %v1655_v14, %v2123_v22  ;;  %v639_v2 = vadd.f32 1e-12, %v575_v52 }
 0x170   :  { %v760_v62 = vmul.f32 %v1657_v44, %v2130_v7  ;;  %v640_v10 = vadd.f32 1e-12, %v576_v60  ;;  %v485_v1 = vpop.xlane.xlu1 %484  ;;  %v487_v59 = vpop.xlane.xlu0 %486  ;;  %v900_v39 = vadd.f32 %v2329_v35, %v829_v48 }
 0x171   :  { %v1465_v6 = vpack.c.bf16 %v899_v29, %v898_v20  ;;  %v830_v25 = vmul.f32 %v2322_v31, %v759_v5  ;;  %1670 = vrsqrt.f32 %v639_v2  ;;  %v577_v58 = vmul.f32 0.0078125, %v485_v1 }
 0x172   :  { %v1659_v55 = vpop.eup %1658  ;;  %1672 = vrsqrt.f32 %v640_v10  ;;  %v578_v16 = vmul.f32 0.0078125, %v487_v59  ;;  %v831_v56 = vmul.f32 %v2322_v31, %v760_v62 }
 0x173   :  { %v1661_v33 = vpop.eup %1660  ;;  %1577 = vst [vmem:[#allocation5 + $0x58] sm:$0xff] %v1465_v6   ;;  %v901_v22 = vadd.f32 %v2329_v35, %v830_v25  ;;  %v761_v7 = vmul.f32 %v1659_v55, %v2133_v24  ;;  %v641_v43 = vadd.f32 1e-12, %v577_v58 }
 0x174   :  { %v762_v27 = vmul.f32 %v1661_v33, %v2140_v9  ;;  %v642_v0 = vadd.f32 1e-12, %v578_v16  ;;  %v489_v47 = vpop.xlane.xlu1 %488  ;;  %v491_v28 = vpop.xlane.xlu0 %490  ;;  %v902_v24 = vadd.f32 %v2329_v35, %v831_v56 }
 0x175   :  { %v1470_v61 = vpack.c.bf16 %v901_v22, %v900_v39  ;;  %v832_v12 = vmul.f32 %v2322_v31, %v761_v7  ;;  %1674 = vrsqrt.f32 %v641_v43  ;;  %v579_v42 = vmul.f32 0.0078125, %v489_v47 }
 0x176   :  { %v1663_v53 = vpop.eup %1662  ;;  %v833_v46 = vmul.f32 %v2322_v31, %v762_v27  ;;  %1676 = vrsqrt.f32 %v642_v0  ;;  %v580_v4 = vmul.f32 0.0078125, %v491_v28 }
 0x177   :  { %v1665_v8 = vpop.eup %1664  ;;  %1578 = vst [vmem:[#allocation5 + $0x60] sm:$0xff] %v1470_v61   ;;  %v903_v18 = vadd.f32 %v2329_v35, %v832_v12  ;;  %v763_v9 = vmul.f32 %v1663_v53, %v2143_v26  ;;  %v643_v37 = vadd.f32 1e-12, %v579_v42 }
 0x178   :  { %v764_v3 = vmul.f32 %v1665_v8, %v2148_v11  ;;  %v644_v54 = vadd.f32 1e-12, %v580_v4  ;;  %v493_v51 = vpop.xlane.xlu1 %492  ;;  %v495_v45 = vpop.xlane.xlu0 %494  ;;  %v904_v52 = vadd.f32 %v2329_v35, %v833_v46 }
 0x179   :  { %v1475_v50 = vpack.c.bf16 %v903_v18, %v902_v24  ;;  %v834_v57 = vmul.f32 %v2322_v31, %v763_v9  ;;  %1678 = vrsqrt.f32 %v643_v37  ;;  %v581_v41 = vmul.f32 0.0078125, %v493_v51 }
 0x17a   :  { %v1667_v49 = vpop.eup %1666  ;;  %1680 = vrsqrt.f32 %v644_v54  ;;  %v582_v14 = vmul.f32 0.0078125, %v495_v45  ;;  %v835_v60 = vmul.f32 %v2322_v31, %v764_v3 }
 0x17b   :  { %v1669_v48 = vpop.eup %1668  ;;  %1579 = vst [vmem:[#allocation5 + $0x68] sm:$0xff] %v1475_v50   ;;  %v905_v26 = vadd.f32 %v2329_v35, %v834_v57  ;;  %v765_v11 = vmul.f32 %v1667_v49, %v2151_v63  ;;  %v645_v44 = vadd.f32 1e-12, %v581_v41 }
 0x17c   :  { %v766_v20 = vmul.f32 %v1669_v48, %v2158_v13  ;;  %v646_v29 = vadd.f32 1e-12, %v582_v14  ;;  %v497_v5 = vpop.xlane.xlu1 %496  ;;  %v499_v2 = vpop.xlane.xlu0 %498  ;;  %v906_v63 = vadd.f32 %v2329_v35, %v835_v60 }
 0x17d   :  { %v1480_v62 = vpack.c.bf16 %v905_v26, %v904_v52  ;;  %v836_v10 = vmul.f32 %v2322_v31, %v765_v11  ;;  %1682 = vrsqrt.f32 %v645_v44  ;;  %v583_v1 = vmul.f32 0.0078125, %v497_v5 }
 0x17e   :  { %v1671_v59 = vpop.eup %1670  ;;  %v837_v6 = vmul.f32 %v2322_v31, %v766_v20  ;;  %1684 = vrsqrt.f32 %v646_v29  ;;  %v584_v25 = vmul.f32 0.0078125, %v499_v2 }
 0x17f   :  { %v1673_v58 = vpop.eup %1672  ;;  %1580 = vst [vmem:[#allocation5 + $0x70] sm:$0xff] %v1480_v62   ;;  %v907_v55 = vadd.f32 %v2329_v35, %v836_v10  ;;  %v767_v13 = vmul.f32 %v1671_v59, %v2161_v30  ;;  %v647_v39 = vadd.f32 1e-12, %v583_v1 }
 0x180   :  { %v768_v16 = vmul.f32 %v1673_v58, %v2168_v15  ;;  %v648_v33 = vadd.f32 1e-12, %v584_v25  ;;  %v501_v22 = vpop.xlane.xlu1 %500  ;;  %v503_v56 = vpop.xlane.xlu0 %502  ;;  %v908_v47 = vadd.f32 %v2329_v35, %v837_v6 }
 0x181   :  { %v1485_v7 = vpack.c.bf16 %v907_v55, %v906_v63  ;;  %v838_v43 = vmul.f32 %v2322_v31, %v767_v13  ;;  %1686 = vrsqrt.f32 %v647_v39  ;;  %v585_v27 = vmul.f32 0.0078125, %v501_v22 }
 0x182   :  { %v1675_v0 = vpop.eup %1674  ;;  %1688 = vrsqrt.f32 %v648_v33  ;;  %v586_v28 = vmul.f32 0.0078125, %v503_v56  ;;  %v839_v12 = vmul.f32 %v2322_v31, %v768_v16 }
 0x183   :  { %v1677_v61 = vpop.eup %1676  ;;  %1581 = vst [vmem:[#allocation5 + $0x78] sm:$0xff] %v1485_v7   ;;  %v909_v30 = vadd.f32 %v2329_v35, %v838_v43  ;;  %v769_v15 = vmul.f32 %v1675_v0, %v2171_v32  ;;  %v649_v42 = vadd.f32 1e-12, %v585_v27 }
 0x184   :  { %v770_v53 = vmul.f32 %v1677_v61, %v2178_v17  ;;  %v650_v46 = vadd.f32 1e-12, %v586_v28  ;;  %v505_v4 = vpop.xlane.xlu1 %504  ;;  %v507_v8 = vpop.xlane.xlu0 %506  ;;  %v910_v32 = vadd.f32 %v2329_v35, %v839_v12 }
 0x185   :  { %v1490_v24 = vpack.c.bf16 %v909_v30, %v908_v47  ;;  %v840_v18 = vmul.f32 %v2322_v31, %v769_v15  ;;  %1690 = vrsqrt.f32 %v649_v42  ;;  %v587_v9 = vmul.f32 0.0078125, %v505_v4  ;;  %v2601_v42 = vld [vmem:[#allocation21_spill] sm:$0xff] }
 0x186   :  { %v1679_v37 = vpop.eup %1678  ;;  %v841_v3 = vmul.f32 %v2322_v31, %v770_v53  ;;  %1692 = vrsqrt.f32 %v650_v46  ;;  %v588_v54 = vmul.f32 0.0078125, %v507_v8 }
 0x187   :  { %v1681_v51 = vpop.eup %1680  ;;  %1582 = vst [vmem:[#allocation5 + $0x80] sm:$0xff] %v1490_v24   ;;  %v911_v45 = vadd.f32 %v2329_v35, %v840_v18  ;;  %v771_v17 = vmul.f32 %v1679_v37, %v2181_v34  ;;  %v651_v50 = vadd.f32 1e-12, %v587_v9 }
 0x188   :  { %v772_v57 = vmul.f32 %v1681_v51, %v2188_v19  ;;  %v652_v41 = vadd.f32 1e-12, %v588_v54  ;;  %v509_v49 = vpop.xlane.xlu1 %508  ;;  %v511_v52 = vpop.xlane.xlu0 %510  ;;  %v912_v11 = vadd.f32 %v2329_v35, %v841_v3 }
 0x189   :  { %v1495_v14 = vpack.c.bf16 %v911_v45, %v910_v32  ;;  %v842_v48 = vmul.f32 %v2322_v31, %v771_v17  ;;  %1694 = vrsqrt.f32 %v651_v50  ;;  %v589_v26 = vmul.f32 0.0078125, %v509_v49  ;;  %v2602_v45 = vld [vmem:[#allocation22_spill] sm:$0xff] }
 0x18a   :  { %v1683_v60 = vpop.eup %1682  ;;  %1696 = vrsqrt.f32 %v652_v41  ;;  %v590_v44 = vmul.f32 0.0078125, %v511_v52  ;;  %v843_v29 = vmul.f32 %v2322_v31, %v772_v57  ;;  %v2603_v57 = vld [vmem:[#allocation23_spill] sm:$0xff] }
 0x18b   :  { %v1685_v20 = vpop.eup %1684  ;;  %1583 = vst [vmem:[#allocation5 + $0x88] sm:$0xff] %v1495_v14   ;;  %v913_v34 = vadd.f32 %v2329_v35, %v842_v48  ;;  %v773_v19 = vmul.f32 %v1683_v60, %v2191_v36  ;;  %v653_v5 = vadd.f32 1e-12, %v589_v26 }
 0x18c   :  { %v774_v2 = vmul.f32 %v1685_v20, %v2198_v21  ;;  %v654_v62 = vadd.f32 1e-12, %v590_v44  ;;  %v513_v10 = vpop.xlane.xlu1 %512  ;;  %v515_v1 = vpop.xlane.xlu0 %514  ;;  %v914_v36 = vadd.f32 %v2329_v35, %v843_v29 }
 0x18d   :  { %v1500_v59 = vpack.c.bf16 %v913_v34, %v912_v11  ;;  %v844_v6 = vmul.f32 %v2322_v31, %v773_v19  ;;  %1698 = vrsqrt.f32 %v653_v5  ;;  %v591_v25 = vmul.f32 0.0078125, %v513_v10  ;;  %v2604_v5 = vld [vmem:[#allocation24_spill] sm:$0xff]  ;;  %v2605_v10 = vld [vmem:[#allocation25_spill] sm:$0xff] }
 0x18e   :  { %v1687_v58 = vpop.eup %1686  ;;  %v845_v63 = vmul.f32 %v2322_v31, %v774_v2  ;;  %1700 = vrsqrt.f32 %v654_v62  ;;  %v592_v55 = vmul.f32 0.0078125, %v515_v1 }
 0x18f   :  { %v1689_v13 = vpop.eup %1688  ;;  %1584 = vst [vmem:[#allocation5 + $0x90] sm:$0xff] %v1500_v59   ;;  %v915_v39 = vadd.f32 %v2329_v35, %v844_v6  ;;  %v775_v21 = vmul.f32 %v1687_v58, %v2201_v38  ;;  %v655_v16 = vadd.f32 1e-12, %v591_v25 }
 0x190   :  { %v776_v33 = vmul.f32 %v1689_v13, %v2208_v23  ;;  %v656_v22 = vadd.f32 1e-12, %v592_v55  ;;  %v517_v56 = vpop.xlane.xlu1 %516  ;;  %v519_v7 = vpop.xlane.xlu0 %518  ;;  %v916_v28 = vadd.f32 %v2329_v35, %v845_v63 }
 0x191   :  { %v1505_v43 = vpack.c.bf16 %v915_v39, %v914_v36  ;;  %v846_v27 = vmul.f32 %v2322_v31, %v775_v21  ;;  %1702 = vrsqrt.f32 %v655_v16  ;;  %v593_v0 = vmul.f32 0.0078125, %v517_v56 }
 0x192   :  { %v1691_v47 = vpop.eup %1690  ;;  %1704 = vrsqrt.f32 %v656_v22  ;;  %v594_v61 = vmul.f32 0.0078125, %v519_v7  ;;  %v847_v12 = vmul.f32 %v2322_v31, %v776_v33  ;;  %v2606_v22 = vld [vmem:[#allocation26_spill] sm:$0xff] }
 0x193   :  { %v1693_v30 = vpop.eup %1692  ;;  %1585 = vst [vmem:[#allocation5 + $0x98] sm:$0xff] %v1505_v43   ;;  %v917_v38 = vadd.f32 %v2329_v35, %v846_v27  ;;  %v777_v23 = vmul.f32 %v1691_v47, %v2211_v40  ;;  %v657_v15 = vadd.f32 1e-12, %v593_v0  ;;  %v2607_v43 = vld [vmem:[#allocation27_spill] sm:$0xff] }
 0x194   :  { %v778_v53 = vmul.f32 %v1693_v30, %v2601_v42  ;;  %v658_v46 = vadd.f32 1e-12, %v594_v61  ;;  %v521_v4 = vpop.xlane.xlu1 %520  ;;  %v523_v8 = vpop.xlane.xlu0 %522  ;;  %v918_v40 = vadd.f32 %v2329_v35, %v847_v12 }
 0x195   :  { %v1510_v24 = vpack.c.bf16 %v917_v38, %v916_v28  ;;  %v848_v18 = vmul.f32 %v2322_v31, %v777_v23  ;;  %1706 = vrsqrt.f32 %v657_v15  ;;  %v595_v9 = vmul.f32 0.0078125, %v521_v4  ;;  %v2608_v4 = vld [vmem:[#allocation8_spill] sm:$0xff] }
 0x196   :  { %v1695_v37 = vpop.eup %1694  ;;  %v849_v3 = vmul.f32 %v2322_v31, %v778_v53  ;;  %1708 = vrsqrt.f32 %v658_v46  ;;  %v596_v54 = vmul.f32 0.0078125, %v523_v8 }
 0x197   :  { %v1697_v51 = vpop.eup %1696  ;;  %1586 = vst [vmem:[#allocation5 + $0xa0] sm:$0xff] %v1510_v24   ;;  %v919_v32 = vadd.f32 %v2329_v35, %v848_v18  ;;  %v779_v17 = vmul.f32 %v1695_v37, %v2602_v45  ;;  %v659_v50 = vadd.f32 1e-12, %v595_v9  ;;  %v2609_v18 = vld [vmem:[#allocation9_spill] sm:$0xff] }
 0x198   :  { %v780_v41 = vmul.f32 %v1697_v51, %v2603_v57  ;;  %v660_v49 = vadd.f32 1e-12, %v596_v54  ;;  %v525_v52 = vpop.xlane.xlu1 %524  ;;  %v527_v14 = vpop.xlane.xlu0 %526  ;;  %v920_v44 = vadd.f32 %v2329_v35, %v849_v3 }
 0x199   :  { %v1515_v48 = vpack.c.bf16 %v919_v32, %v918_v40  ;;  %v850_v26 = vmul.f32 %v2322_v31, %v779_v17  ;;  %1710 = vrsqrt.f32 %v659_v50  ;;  %v597_v60 = vmul.f32 0.0078125, %v525_v52  ;;  %v2610_v52 = vld [vmem:[#allocation10_spill] sm:$0xff] }
 0x19a   :  { %v1699_v11 = vpop.eup %1698  ;;  %1712 = vrsqrt.f32 %v660_v49  ;;  %v598_v20 = vmul.f32 0.0078125, %v527_v14  ;;  %v851_v19 = vmul.f32 %v2322_v31, %v780_v41 }
 0x19b   :  { %v1701_v34 = vpop.eup %1700  ;;  %1587 = vst [vmem:[#allocation5 + $0xa8] sm:$0xff] %v1515_v48   ;;  %v921_v29 = vadd.f32 %v2329_v35, %v850_v26  ;;  %v781_v2 = vmul.f32 %v1699_v11, %v2604_v5  ;;  %v661_v62 = vadd.f32 1e-12, %v597_v60  ;;  %v2611_v26 = vld [vmem:[#allocation11_spill] sm:$0xff] }
 0x19c   :  { %v782_v1 = vmul.f32 %v1701_v34, %v2605_v10  ;;  %v662_v59 = vadd.f32 1e-12, %v598_v20  ;;  %v529_v6 = vpop.xlane.xlu1 %528  ;;  %v531_v25 = vpop.xlane.xlu0 %530  ;;  %v922_v16 = vadd.f32 %v2329_v35, %v851_v19 }
 0x19d   :  { %v1520_v58 = vpack.c.bf16 %v921_v29, %v920_v44  ;;  %v852_v63 = vmul.f32 %v2322_v31, %v781_v2  ;;  %1714 = vrsqrt.f32 %v661_v62  ;;  %v599_v55 = vmul.f32 0.0078125, %v529_v6 }
 0x19e   :  { %v1703_v13 = vpop.eup %1702  ;;  %v853_v36 = vmul.f32 %v2322_v31, %v782_v1  ;;  %1716 = vrsqrt.f32 %v662_v59  ;;  %v600_v39 = vmul.f32 0.0078125, %v531_v25  ;;  %v2612_v1 = vld [vmem:[#allocation12_spill] sm:$0xff]  ;;  %v2613_v25 = vld [vmem:[#allocation13_spill] sm:$0xff] }
 0x19f   :  { %v1705_v21 = vpop.eup %1704  ;;  %1588 = vst [vmem:[#allocation5 + $0xb0] sm:$0xff] %v1520_v58   ;;  %v923_v33 = vadd.f32 %v2329_v35, %v852_v63  ;;  %v783_v56 = vmul.f32 %v1703_v13, %v2606_v22  ;;  %v663_v7 = vadd.f32 1e-12, %v599_v55 }
 0x1a0   :  { %v784_v27 = vmul.f32 %v1705_v21, %v2607_v43  ;;  %v664_v0 = vadd.f32 1e-12, %v600_v39  ;;  %v533_v47 = vpop.xlane.xlu1 %532  ;;  %v535_v28 = vpop.xlane.xlu0 %534  ;;  %v924_v23 = vadd.f32 %v2329_v35, %v853_v36 }
 0x1a1   :  { %v1525_v61 = vpack.c.bf16 %v923_v33, %v922_v16  ;;  %v854_v30 = vmul.f32 %v2322_v31, %v783_v56  ;;  %1718 = vrsqrt.f32 %v663_v7  ;;  %v601_v38 = vmul.f32 0.0078125, %v533_v47  ;;  %v2614_v33 = vld [vmem:[#allocation14_spill] sm:$0xff]  ;;  %v2615_v56 = vld [vmem:[#allocation15_spill] sm:$0xff] }
 0x1a2   :  { %v1707_v12 = vpop.eup %1706  ;;  %1720 = vrsqrt.f32 %v664_v0  ;;  %v602_v15 = vmul.f32 0.0078125, %v535_v28  ;;  %v855_v46 = vmul.f32 %v2322_v31, %v784_v27 }
 0x1a3   :  { %v1709_v42 = vpop.eup %1708  ;;  %1589 = vst [vmem:[#allocation5 + $0xb8] sm:$0xff] %v1525_v61   ;;  %v925_v53 = vadd.f32 %v2329_v35, %v854_v30  ;;  %v785_v8 = vmul.f32 %v1707_v12, %v2608_v4  ;;  %v665_v24 = vadd.f32 1e-12, %v601_v38  ;;  %v1732_v30 = vld [vmem:[%s2519_s1] ss:$0 sm:$0xff]  ;;  %s1781_s1 = smov [#allocation5]  }
 0x1a4   :  { %v786_v9 = vmul.f32 %v1709_v42, %v2609_v18  ;;  %v666_v37 = vadd.f32 1e-12, %v602_v15  ;;  %v537_v3 = vpop.xlane.xlu1 %536  ;;  %v539_v54 = vpop.xlane.xlu0 %538  ;;  %v926_v41 = vadd.f32 %v2329_v35, %v855_v46  ;;  %v2616_v12 = vld [vmem:[#allocation16_spill] sm:$0xff]  ;;  %v2617_v15 = vld [vmem:[#allocation17_spill] sm:$0xff] }
 0x1a5   :  { %v1530_v51 = vpack.c.bf16 %v925_v53, %v924_v23  ;;  %v856_v40 = vmul.f32 %v2322_v31, %v785_v8  ;;  %1722 = vrsqrt.f32 %v665_v24  ;;  %v603_v32 = vmul.f32 0.0078125, %v537_v3  ;;  %v1733_v8 = vld [vmem:[%s2520_s2] ss:$0 sm:$0xff]  ;;  %s1265_s2 = sshll.u32 %s1781_s1, 4  ;;  %s1266_s2 = int_to_ptr.vmem [resolvable:$true] %s1265_s2 }
 0x1a6   :  { %v1711_v45 = vpop.eup %1710  ;;  %v857_v17 = vmul.f32 %v2322_v31, %v786_v9  ;;  %1724 = vrsqrt.f32 %v666_v37  ;;  %v604_v50 = vmul.f32 0.0078125, %v539_v54  ;;  %v2618_v9 = vld [vmem:[#allocation18_spill] sm:$0xff]  ;;  %v2619_v3 = vld [vmem:[#allocation28_spill] sm:$0xff]  ;;  %s1754_s26 = scalar_lea.vmem %s1266_s2, 4096  ;;  %p1759_p6 = scmp.lt.s32.totalorder %s1266_s2, %s1266_s2 }
 0x1a7   :  { %v1713_v57 = vpop.eup %1712  ;;  %1590 = vst [vmem:[#allocation5 + $0xc0] sm:$0xff] %v1530_v51   ;;  %v927_v49 = vadd.f32 %v2329_v35, %v856_v40  ;;  %v787_v14 = vmul.f32 %v1711_v45, %v2610_v52  ;;  %v667_v48 = vadd.f32 1e-12, %v603_v32  ;;  %p1755_p5 = scmp.ne.s32.totalorder %s1266_s2, %s1754_s26  ;;  %p1760_p7 = scmp.lt.s32.totalorder %s1754_s26, %s1754_s26 }
 0x1a8   :  { %v788_v60 = vmul.f32 %v1713_v57, %v2611_v26  ;;  %v668_v11 = vadd.f32 1e-12, %v604_v50  ;;  %v541_v44 = vpop.xlane.xlu1 %540  ;;  %v928_v5 = vadd.f32 %v2329_v35, %v857_v17  ;;  %v2620_v57 = vld [vmem:[#allocation19_spill] sm:$0xff] }
 0x1a9   :  { %v1535_v20 = vpack.c.bf16 %v927_v49, %v926_v41  ;;  %v858_v34 = vmul.f32 %v2322_v31, %v787_v14  ;;  %1726 = vrsqrt.f32 %v667_v48  ;;  %v605_v29 = vmul.f32 0.0078125, %v541_v44  ;;  %p1761_p8 = por %p1760_p7, %p1759_p6 }
 0x1aa   :  { %v1715_v19 = vpop.eup %1714  ;;  %1728 = vrsqrt.f32 %v668_v11  ;;  %v859_v10 = vmul.f32 %v2322_v31, %v788_v60 }
 0x1ab   :  { %v1717_v2 = vpop.eup %1716  ;;  %1591 = vst [vmem:[#allocation5 + $0xc8] sm:$0xff] %v1535_v20   ;;  %v929_v62 = vadd.f32 %v2329_v35, %v858_v34  ;;  %v789_v59 = vmul.f32 %v1715_v19, %v2612_v1  ;;  %v669_v6 = vadd.f32 1e-12, %v605_v29  ;;  %p1762_p9 = pnand %p1761_p8, %p1755_p5 }
 0x1ac   :  { %v790_v58 = vmul.f32 %v1717_v2, %v2613_v25  ;;  %v930_v39 = vadd.f32 %v2329_v35, %v859_v10 }
 0x1ad   :  { %v1540_v63 = vpack.c.bf16 %v929_v62, %v928_v5  ;;  %v860_v55 = vmul.f32 %v2322_v31, %v789_v59  ;;  %1730 = vrsqrt.f32 %v669_v6 }
 0x1ae   :  { %v1719_v13 = vpop.eup %1718  ;;  %v861_v16 = vmul.f32 %v2322_v31, %v790_v58 }
 0x1af   :  { %v1721_v36 = vpop.eup %1720  ;;  %1592 = vst [vmem:[#allocation5 + $0xd0] sm:$0xff] %v1540_v63   ;;  %v931_v21 = vadd.f32 %v2329_v35, %v860_v55  ;;  %v791_v22 = vmul.f32 %v1719_v13, %v2614_v33 }
 0x1b0   :  { %v792_v7 = vmul.f32 %v1721_v36, %v2615_v56  ;;  %v932_v28 = vadd.f32 %v2329_v35, %v861_v16 }
 0x1b1   :  { %v1545_v43 = vpack.c.bf16 %v931_v21, %v930_v39  ;;  %v862_v27 = vmul.f32 %v2322_v31, %v791_v22 }
 0x1b2   :  { %v1723_v0 = vpop.eup %1722  ;;  %v863_v38 = vmul.f32 %v1732_v30, %v792_v7 }
 0x1b3   :  { %v1725_v47 = vpop.eup %1724  ;;  %1593 = vst [vmem:[#allocation5 + $0xd8] sm:$0xff] %v1545_v43   ;;  %v933_v61 = vadd.f32 %v2329_v35, %v862_v27  ;;  %v793_v23 = vmul.f32 %v1723_v0, %v2616_v12 }
 0x1b4   :  { %v794_v42 = vmul.f32 %v1725_v47, %v2617_v15  ;;  %v934_v24 = vadd.f32 %v1733_v8, %v863_v38 }
 0x1b5   :  { %v1550_v53 = vpack.c.bf16 %v933_v61, %v932_v28  ;;  %v864_v46 = vmul.f32 %v1732_v30, %v793_v23 }
 0x1b6   :  { %v1727_v4 = vpop.eup %1726  ;;  %v865_v18 = vmul.f32 %v1732_v30, %v794_v42 }
 0x1b7   :  { %v1729_v31 = vpop.eup %1728  ;;  %1594 = vst [vmem:[#allocation5 + $0xe0] sm:$0xff] %v1550_v53   ;;  %v935_v35 = vadd.f32 %v1733_v8, %v864_v46  ;;  %v795_v37 = vmul.f32 %v1727_v4, %v2618_v9 }
 0x1b8   :  { %v796_v54 = vmul.f32 %v1729_v31, %v2619_v3  ;;  %v936_v45 = vadd.f32 %v1733_v8, %v865_v18 }
 0x1b9   :  { %v1555_v51 = vpack.c.bf16 %v935_v35, %v934_v24  ;;  %v866_v40 = vmul.f32 %v1732_v30, %v795_v37 }
 0x1ba   :  { %v1731_v32 = vpop.eup %1730  ;;  %v867_v50 = vmul.f32 %v1732_v30, %v796_v54 }
 0x1bb   :  { %1595 = vst [vmem:[#allocation5 + $0xe8] sm:$0xff] %v1555_v51   ;;  %v937_v17 = vadd.f32 %v1733_v8, %v866_v40  ;;  %v797_v41 = vmul.f32 %v1731_v32, %v2620_v57 }
 0x1bc   :  { %v938_v14 = vadd.f32 %v1733_v8, %v867_v50 }
 0x1bd   :  { %v1560_v49 = vpack.c.bf16 %v937_v17, %v936_v45  ;;  %v868_v52 = vmul.f32 %v1732_v30, %v797_v41 }
 0x1bf   :  { %1596 = vst [vmem:[#allocation5 + $0xf0] sm:$0xff] %v1560_v49   ;;  %v939_v48 = vadd.f32 %v1733_v8, %v868_v52 }
 0x1c1   :  { %v1565_v26 = vpack.c.bf16 %v939_v48, %v938_v14 }
 0x1c3   :  { %1597 = vst [vmem:[#allocation5 + $0xf8] sm:$0xff] %v1565_v26  }
 0x1c4   :  { %1765 = shalt.err (!%p1762_p9)
}
 0x1c5   :  { %s1782_s27 = smov 64   ;;  %s1783_s28 = smov 4  }
 0x1c6   :  { %1271 = dma.vmem_to_hbm [thread:$0]  %s1266_s2, 4096, %s2521_s3, [#allocation4], %s1782_s27, %s1782_s27, %s1783_s28  }
 0x1c7   :  { %1776 = dma.done.wait [#allocation4], 4096  }
 0x1c8   :  { %1777 = vsyncadd [#allocation4], 4294963200 }
 0x1c9   :  { %1275 = vsyncpa [#allocation3], 1 }
 0x1ca   :  { %1276 = vsyncpa [#allocation4], 1 }

</bundles_post_ra>
